<compile_context>
chip_gen: v7x
topology: tpu7x:2x2x1
jax: 0.10.0
libtpu: 0.0.40
codegen_flags: <defaults>
</compile_context>

<pallas_src>
import functools

import jax
import jax.numpy as jnp
from jax import lax
from jax.experimental import pallas as pl
from jax.experimental.pallas import tpu as pltpu

EPS = 1e-5  # nn.BatchNorm2d default


def _compiler_params():
    return pltpu.CompilerParams(
        dimension_semantics=("parallel", "parallel"),
        vmem_limit_bytes=32 * 1024 * 1024)


# --------------------------- pass A: depthwise conv + BN1 partials ---------------------------
def _depthwise_stats_kernel(x_ref, w_ref, dw_ref, stat_ref, *,
                            th, w_out, c_in, d, stride):
    """x_ref   : (1, Hp, Wp, Cin)   whole zero-padded image (revisited across row tiles)
       w_ref   : (9, Cin)           depthwise taps, row index = kh*3 + kw
       dw_ref  : (1, TH, Wout, Cin) depthwise output row-tile
       stat_ref: (1, 1, 2, Cin)     per-tile [sum; sum_of_squares]
    """
    t = pl.program_id(1)
    row_span = (th - 1) * stride + 2 * d + 1
    row0 = t * th * stride
    win = x_ref[0, pl.ds(row0, row_span), :, :]          # (row_span, Wp, Cin)
    w_all = w_ref[...]                                   # (9, Cin)

    acc = jnp.zeros((th, w_out, c_in), jnp.float32)
    for kh in range(3):
        for kw in range(3):
            tap = win[kh * d: kh * d + (th - 1) * stride + 1: stride,
                      kw * d: kw * d + (w_out - 1) * stride + 1: stride, :]
            acc = acc + tap * w_all[kh * 3 + kw][None, None, :]

    dw_ref[0] = acc
    flat = acc.reshape(th * w_out, c_in)
    stat_ref[0, 0] = jnp.concatenate(
        [jnp.sum(flat, axis=0, keepdims=True),
         jnp.sum(flat * flat, axis=0, keepdims=True)], axis=0)


# ---------------- pass B: BN1 (scale/shift) + ReLU + pointwise 1x1 + BN2 partials -------------
def _pointwise_stats_kernel(dw_ref, bn1_ref, pw_ref, y_ref, stat_ref, *,
                            th, w_out, c_in, c_out):
    m_t = th * w_out
    h = dw_ref[0].reshape(m_t, c_in)                     # rows = spatial, lanes = Cin
    bn1 = bn1_ref[...]                                   # (2, Cin): [scale; shift]
    h = jnp.maximum(h * bn1[0:1, :] + bn1[1:2, :], 0.0)
    # NOTE: at production channel widths (>=128) feed the MXU in bf16
    # (h.astype(bf16) @ pw.astype(bf16), preferred_element_type=f32); kept f32 here
    # because the test channels are tiny and the reference is f32.
    y = jnp.dot(h, pw_ref[...], preferred_element_type=jnp.float32)   # (m_t, Cout)
    y_ref[0] = y.reshape(th, w_out, c_out)
    stat_ref[0, 0] = jnp.concatenate(
        [jnp.sum(y, axis=0, keepdims=True),
         jnp.sum(y * y, axis=0, keepdims=True)], axis=0)


# --------------------------- pass C: BN2 (scale/shift) + ReLU --------------------------------
def _bn_relu_kernel(y_ref, bn2_ref, o_ref, *, th, w_out, c_out):
    m_t = th * w_out
    y = y_ref[0].reshape(m_t, c_out)
    bn2 = bn2_ref[...]                                   # (2, Cout): [scale; shift]
    o = jnp.maximum(y * bn2[0:1, :] + bn2[1:2, :], 0.0)
    o_ref[0] = o.reshape(th, w_out, c_out)


def _bn_scale_shift(stats, gamma, beta, count):
    """stats: (N, HT, 2, C) per-tile [sum; sumsq] -> (2, C) stacked [scale; shift]."""
    s = jnp.sum(stats, axis=(0, 1))                      # (2, C)
    mean = s[0] / count
    var = jnp.maximum(s[1] / count - mean * mean, 0.0)   # biased var (train-mode BN)
    scale = gamma * lax.rsqrt(var + EPS)
    shift = beta - mean * scale
    return jnp.stack([scale, shift], axis=0)


def block_mobilenet_forward(x_nchw, params, dilation, stride=1, row_tile=8):
    """NCHW in / NCHW out (PyTorch convention), parameters in PyTorch shapes."""
    dw_w, g1, b1, pw_w, g2, b2 = params
    n, c_in, h, w = x_nchw.shape
    c_out = pw_w.shape[0]
    d = dilation
    h_out = (h - 1) // stride + 1
    w_out = (w - 1) // stride + 1
    hp, wp = h + 2 * d, w + 2 * d

    # largest row-tile <= row_tile that divides h_out, so blocks are exact and the
    # per-tile BN partial sums never see padded garbage
    th = 1
    for cand in range(min(row_tile, h_out), 0, -1):
        if h_out % cand == 0:
            th = cand
            break
    ht = h_out // th

    # boundary layout: NCHW -> NHWC (channels on the lane axis), zero-pad H/W by
    # `dilation` (== PyTorch padding=dilation).
    # TODO(synk): in a full network keep activations NHWC end-to-end to avoid these ops.
    x = jnp.transpose(x_nchw, (0, 2, 3, 1)).astype(jnp.float32)
    x_pad = jnp.pad(x, ((0, 0), (d, d), (d, d), (0, 0)))

    dw_taps = jnp.transpose(dw_w.reshape(c_in, 9), (1, 0)).astype(jnp.float32)     # (9, Cin)
    pw_mat = jnp.transpose(pw_w.reshape(c_out, c_in), (1, 0)).astype(jnp.float32)  # (Cin, Cout)

    # ---- pass A: depthwise conv + BN1 partial stats ----
    kern_a = functools.partial(_depthwise_stats_kernel, th=th, w_out=w_out,
                               c_in=c_in, d=d, stride=stride)
    dw_act, stats1 = pl.pallas_call(
        kern_a,
        grid=(n, ht),
        in_specs=[pl.BlockSpec((1, hp, wp, c_in), lambda b, t: (b, 0, 0, 0)),
                  pl.BlockSpec((9, c_in), lambda b, t: (0, 0))],
        out_specs=(pl.BlockSpec((1, th, w_out, c_in), lambda b, t: (b, t, 0, 0)),
                   pl.BlockSpec((1, 1, 2, c_in), lambda b, t: (b, t, 0, 0))),
        out_shape=(jax.ShapeDtypeStruct((n, h_out, w_out, c_in), jnp.float32),
                   jax.ShapeDtypeStruct((n, ht, 2, c_in), jnp.float32)),
        compiler_params=_compiler_params(),
    )(x_pad, dw_taps)

    count = n * h_out * w_out
    bn1 = _bn_scale_shift(stats1, g1.astype(jnp.float32), b1.astype(jnp.float32), count)

    # ---- pass B: BN1+ReLU + pointwise 1x1 conv (channel matmul) + BN2 partial stats ----
    kern_b = functools.partial(_pointwise_stats_kernel, th=th, w_out=w_out,
                               c_in=c_in, c_out=c_out)
    y_act, stats2 = pl.pallas_call(
        kern_b,
        grid=(n, ht),
        in_specs=[pl.BlockSpec((1, th, w_out, c_in), lambda b, t: (b, t, 0, 0)),
                  pl.BlockSpec((2, c_in), lambda b, t: (0, 0)),
                  pl.BlockSpec((c_in, c_out), lambda b, t: (0, 0))],
        out_specs=(pl.BlockSpec((1, th, w_out, c_out), lambda b, t: (b, t, 0, 0)),
                   pl.BlockSpec((1, 1, 2, c_out), lambda b, t: (b, t, 0, 0))),
        out_shape=(jax.ShapeDtypeStruct((n, h_out, w_out, c_out), jnp.float32),
                   jax.ShapeDtypeStruct((n, ht, 2, c_out), jnp.float32)),
        compiler_params=_compiler_params(),
    )(dw_act, bn1, pw_mat)

    bn2 = _bn_scale_shift(stats2, g2.astype(jnp.float32), b2.astype(jnp.float32), count)

    # ---- pass C: BN2+ReLU ----
    kern_c = functools.partial(_bn_relu_kernel, th=th, w_out=w_out, c_out=c_out)
    out_nhwc = pl.pallas_call(
        kern_c,
        grid=(n, ht),
        in_specs=[pl.BlockSpec((1, th, w_out, c_out), lambda b, t: (b, t, 0, 0)),
                  pl.BlockSpec((2, c_out), lambda b, t: (0, 0))],
        out_specs=pl.BlockSpec((1, th, w_out, c_out), lambda b, t: (b, t, 0, 0)),
        out_shape=jax.ShapeDtypeStruct((n, h_out, w_out, c_out), jnp.float32),
        compiler_params=_compiler_params(),
    )(y_act, bn2)

    return jnp.transpose(out_nhwc, (0, 3, 1, 2))  # back to NCHW


def reference_forward(x_nchw, params, dilation, stride=1):
    """Pure-JAX reference reproducing the PyTorch module (train-mode BN)."""
    dw_w, g1, b1, pw_w, g2, b2 = params
    _, c_in, _, _ = x_nchw.shape
    d = dilation

    def bn_relu(y, g, b):
        mean = jnp.mean(y, axis=(0, 2, 3), keepdims=True)
        var = jnp.mean((y - mean) ** 2, axis=(0, 2, 3), keepdims=True)
        yn = (y - mean) * lax.rsqrt(var + EPS)
        yn = yn * g.reshape(1, -1, 1, 1) + b.reshape(1, -1, 1, 1)
        return jnp.maximum(yn, 0.0)

    out = lax.conv_general_dilated(
        x_nchw.astype(jnp.float32), dw_w.astype(jnp.float32),
        window_strides=(stride, stride), padding=[(d, d), (d, d)],
        rhs_dilation=(d, d), feature_group_count=c_in,
        dimension_numbers=("NCHW", "OIHW", "NCHW"))
    out = bn_relu(out, g1, b1)
    out = lax.conv_general_dilated(
        out, pw_w.astype(jnp.float32),
        window_strides=(1, 1), padding=[(0, 0), (0, 0)],
        dimension_numbers=("NCHW", "OIHW", "NCHW"))
    out = bn_relu(out, g2, b2)
    return out


if __name__ == "__main__":
    key = jax.random.PRNGKey(0)
    n, c_in, h, w = 2, 4, 16, 16
    c_out = 8
    dilation = 2
    stride = 1

    k1, k2, k3, k4, k5, k6, k7 = jax.random.split(key, 7)
    x = jax.random.normal(k1, (n, c_in, h, w), jnp.float32)
    # Deterministic synthetic parameters (shapes from the module __init__):
    dw_w = 0.5 * jax.random.normal(k2, (c_in, 1, 3, 3), jnp.float32)      # conv1.weight
    pw_w = 0.5 * jax.random.normal(k3, (c_out, c_in, 1, 1), jnp.float32)  # conv2.weight
    g1 = 1.0 + 0.1 * jax.random.normal(k4, (c_in,), jnp.float32)          # bn1.weight
    b1 = 0.1 * jax.random.normal(k5, (c_in,), jnp.float32)                # bn1.bias
    g2 = 1.0 + 0.1 * jax.random.normal(k6, (c_out,), jnp.float32)         # bn2.weight
    b2 = 0.1 * jax.random.normal(k7, (c_out,), jnp.float32)               # bn2.bias
    params = (dw_w, g1, b1, pw_w, g2, b2)

    fwd = jax.jit(functools.partial(block_mobilenet_forward,
                                    dilation=dilation, stride=stride))
    out = fwd(x, params)
    out = jax.block_until_ready(out)

    ref = reference_forward(x, params, dilation, stride)
    assert out.shape == ref.shape == (n, c_out, h, w)
    max_err = float(jnp.max(jnp.abs(out - ref)))
    assert jnp.allclose(out, ref, rtol=2e-3, atol=2e-3), f"max_err={max_err}"

    print("KERNEL_OK")
</pallas_src>

<mosaic_0001>
module attributes {stable_mosaic.version = 11 : i64} {
  func.func @_depthwise_stats_kernel(%arg0: i32, %arg1: i32, %arg2: memref<1x20x20x4xf32, #tpu.memory_space<vmem>>, %arg3: memref<9x4xf32, #tpu.memory_space<vmem>>, %arg4: memref<1x8x16x4xf32, #tpu.memory_space<vmem>>, %arg5: memref<1x1x2x4xf32, #tpu.memory_space<vmem>>) attributes {dimension_semantics = [#tpu.dimension_semantics<parallel>, #tpu.dimension_semantics<parallel>], iteration_bounds = array<i64: 2, 2>, scalar_prefetch = 0 : i64, scratch_operands = 0 : i64, tpu.core_type = #tpu.core_type<tc>, window_params = [{transform_indices = @transform_0, window_bounds = array<i64: 1, 20, 20, 4>}, {pipeline_mode = #tpu.pipeline_mode<synchronous>, transform_indices = @transform_1, window_bounds = array<i64: 9, 4>}, {transform_indices = @transform_2, window_bounds = array<i64: 1, 8, 16, 4>}, {transform_indices = @transform_3, window_bounds = array<i64: 1, 1, 2, 4>}]} {
    %c8_i32 = arith.constant 8 : i32
    %0 = arith.muli %arg1, %c8_i32 : i32
    %c1_i32 = arith.constant 1 : i32
    %1 = arith.muli %0, %c1_i32 : i32
    %c0 = arith.constant 0 : index
    %2 = arith.index_cast %1 : i32 to index
    %c0_0 = arith.constant 0 : index
    %c0_1 = arith.constant 0 : index
    %3 = vector.load %arg2[%c0, %2, %c0_0, %c0_1] : memref<1x20x20x4xf32, #tpu.memory_space<vmem>>, vector<1x12x20x4xf32>
    %4 = vector.shape_cast %3 : vector<1x12x20x4xf32> to vector<12x20x4xf32>
    %c0_2 = arith.constant 0 : index
    %c0_3 = arith.constant 0 : index
    %5 = vector.load %arg3[%c0_2, %c0_3] : memref<9x4xf32, #tpu.memory_space<vmem>>, vector<9x4xf32>
    %cst = arith.constant 0.000000e+00 : f32
    %6 = vector.broadcast %cst : f32 to vector<8x16x4xf32>
    %7 = vector.extract_strided_slice %4 {offsets = [0, 0, 0], sizes = [8, 16, 4], strides = [1, 1, 1]} : vector<12x20x4xf32> to vector<8x16x4xf32>
    %8 = vector.extract_strided_slice %5 {offsets = [0, 0], sizes = [1, 4], strides = [1, 1]} : vector<9x4xf32> to vector<1x4xf32>
    %9 = vector.shape_cast %8 : vector<1x4xf32> to vector<4xf32>
    %10 = vector.shape_cast %9 : vector<4xf32> to vector<1x1x4xf32>
    %11 = vector.broadcast %10 : vector<1x1x4xf32> to vector<8x16x4xf32>
    %12 = arith.mulf %7, %11 : vector<8x16x4xf32>
    %13 = arith.addf %6, %12 : vector<8x16x4xf32>
    %14 = vector.extract_strided_slice %4 {offsets = [0, 2, 0], sizes = [8, 16, 4], strides = [1, 1, 1]} : vector<12x20x4xf32> to vector<8x16x4xf32>
    %15 = vector.extract_strided_slice %5 {offsets = [1, 0], sizes = [1, 4], strides = [1, 1]} : vector<9x4xf32> to vector<1x4xf32>
    %16 = vector.shape_cast %15 : vector<1x4xf32> to vector<4xf32>
    %17 = vector.shape_cast %16 : vector<4xf32> to vector<1x1x4xf32>
    %18 = vector.broadcast %17 : vector<1x1x4xf32> to vector<8x16x4xf32>
    %19 = arith.mulf %14, %18 : vector<8x16x4xf32>
    %20 = arith.addf %13, %19 : vector<8x16x4xf32>
    %21 = vector.extract_strided_slice %4 {offsets = [0, 4, 0], sizes = [8, 16, 4], strides = [1, 1, 1]} : vector<12x20x4xf32> to vector<8x16x4xf32>
    %22 = vector.extract_strided_slice %5 {offsets = [2, 0], sizes = [1, 4], strides = [1, 1]} : vector<9x4xf32> to vector<1x4xf32>
    %23 = vector.shape_cast %22 : vector<1x4xf32> to vector<4xf32>
    %24 = vector.shape_cast %23 : vector<4xf32> to vector<1x1x4xf32>
    %25 = vector.broadcast %24 : vector<1x1x4xf32> to vector<8x16x4xf32>
    %26 = arith.mulf %21, %25 : vector<8x16x4xf32>
    %27 = arith.addf %20, %26 : vector<8x16x4xf32>
    %28 = vector.extract_strided_slice %4 {offsets = [2, 0, 0], sizes = [8, 16, 4], strides = [1, 1, 1]} : vector<12x20x4xf32> to vector<8x16x4xf32>
    %29 = vector.extract_strided_slice %5 {offsets = [3, 0], sizes = [1, 4], strides = [1, 1]} : vector<9x4xf32> to vector<1x4xf32>
    %30 = vector.shape_cast %29 : vector<1x4xf32> to vector<4xf32>
    %31 = vector.shape_cast %30 : vector<4xf32> to vector<1x1x4xf32>
    %32 = vector.broadcast %31 : vector<1x1x4xf32> to vector<8x16x4xf32>
    %33 = arith.mulf %28, %32 : vector<8x16x4xf32>
    %34 = arith.addf %27, %33 : vector<8x16x4xf32>
    %35 = vector.extract_strided_slice %4 {offsets = [2, 2, 0], sizes = [8, 16, 4], strides = [1, 1, 1]} : vector<12x20x4xf32> to vector<8x16x4xf32>
    %36 = vector.extract_strided_slice %5 {offsets = [4, 0], sizes = [1, 4], strides = [1, 1]} : vector<9x4xf32> to vector<1x4xf32>
    %37 = vector.shape_cast %36 : vector<1x4xf32> to vector<4xf32>
    %38 = vector.shape_cast %37 : vector<4xf32> to vector<1x1x4xf32>
    %39 = vector.broadcast %38 : vector<1x1x4xf32> to vector<8x16x4xf32>
    %40 = arith.mulf %35, %39 : vector<8x16x4xf32>
    %41 = arith.addf %34, %40 : vector<8x16x4xf32>
    %42 = vector.extract_strided_slice %4 {offsets = [2, 4, 0], sizes = [8, 16, 4], strides = [1, 1, 1]} : vector<12x20x4xf32> to vector<8x16x4xf32>
    %43 = vector.extract_strided_slice %5 {offsets = [5, 0], sizes = [1, 4], strides = [1, 1]} : vector<9x4xf32> to vector<1x4xf32>
    %44 = vector.shape_cast %43 : vector<1x4xf32> to vector<4xf32>
    %45 = vector.shape_cast %44 : vector<4xf32> to vector<1x1x4xf32>
    %46 = vector.broadcast %45 : vector<1x1x4xf32> to vector<8x16x4xf32>
    %47 = arith.mulf %42, %46 : vector<8x16x4xf32>
    %48 = arith.addf %41, %47 : vector<8x16x4xf32>
    %49 = vector.extract_strided_slice %4 {offsets = [4, 0, 0], sizes = [8, 16, 4], strides = [1, 1, 1]} : vector<12x20x4xf32> to vector<8x16x4xf32>
    %50 = vector.extract_strided_slice %5 {offsets = [6, 0], sizes = [1, 4], strides = [1, 1]} : vector<9x4xf32> to vector<1x4xf32>
    %51 = vector.shape_cast %50 : vector<1x4xf32> to vector<4xf32>
    %52 = vector.shape_cast %51 : vector<4xf32> to vector<1x1x4xf32>
    %53 = vector.broadcast %52 : vector<1x1x4xf32> to vector<8x16x4xf32>
    %54 = arith.mulf %49, %53 : vector<8x16x4xf32>
    %55 = arith.addf %48, %54 : vector<8x16x4xf32>
    %56 = vector.extract_strided_slice %4 {offsets = [4, 2, 0], sizes = [8, 16, 4], strides = [1, 1, 1]} : vector<12x20x4xf32> to vector<8x16x4xf32>
    %57 = vector.extract_strided_slice %5 {offsets = [7, 0], sizes = [1, 4], strides = [1, 1]} : vector<9x4xf32> to vector<1x4xf32>
    %58 = vector.shape_cast %57 : vector<1x4xf32> to vector<4xf32>
    %59 = vector.shape_cast %58 : vector<4xf32> to vector<1x1x4xf32>
    %60 = vector.broadcast %59 : vector<1x1x4xf32> to vector<8x16x4xf32>
    %61 = arith.mulf %56, %60 : vector<8x16x4xf32>
    %62 = arith.addf %55, %61 : vector<8x16x4xf32>
    %63 = vector.extract_strided_slice %4 {offsets = [4, 4, 0], sizes = [8, 16, 4], strides = [1, 1, 1]} : vector<12x20x4xf32> to vector<8x16x4xf32>
    %64 = vector.extract_strided_slice %5 {offsets = [8, 0], sizes = [1, 4], strides = [1, 1]} : vector<9x4xf32> to vector<1x4xf32>
    %65 = vector.shape_cast %64 : vector<1x4xf32> to vector<4xf32>
    %66 = vector.shape_cast %65 : vector<4xf32> to vector<1x1x4xf32>
    %67 = vector.broadcast %66 : vector<1x1x4xf32> to vector<8x16x4xf32>
    %68 = arith.mulf %63, %67 : vector<8x16x4xf32>
    %69 = arith.addf %62, %68 : vector<8x16x4xf32>
    %c0_4 = arith.constant 0 : index
    %c0_5 = arith.constant 0 : index
    %c0_6 = arith.constant 0 : index
    %c0_7 = arith.constant 0 : index
    %70 = vector.load %arg4[%c0_4, %c0_5, %c0_6, %c0_7] : memref<1x8x16x4xf32, #tpu.memory_space<vmem>>, vector<1x8x16x4xf32>
    %71 = vector.shape_cast %70 : vector<1x8x16x4xf32> to vector<8x16x4xf32>
    %72 = vector.shape_cast %69 : vector<8x16x4xf32> to vector<1x8x16x4xf32>
    tpu.vector_store %arg4[%c0_4, %c0_5, %c0_6, %c0_7], %72 {strides = array<i32>} : memref<1x8x16x4xf32, #tpu.memory_space<vmem>>, vector<1x8x16x4xf32>,
    %73 = vector.shape_cast %69 : vector<8x16x4xf32> to vector<128x4xf32>
    %cst_8 = arith.constant dense<0.000000e+00> : vector<4xf32>
    %74 = vector.multi_reduction <add>, %73, %cst_8 [0] : vector<128x4xf32> to vector<4xf32>
    %75 = vector.shape_cast %74 : vector<4xf32> to vector<1x4xf32>
    %76 = arith.mulf %73, %73 : vector<128x4xf32>
    %cst_9 = arith.constant dense<0.000000e+00> : vector<4xf32>
    %77 = vector.multi_reduction <add>, %76, %cst_9 [0] : vector<128x4xf32> to vector<4xf32>
    %78 = vector.shape_cast %77 : vector<4xf32> to vector<1x4xf32>
    %79 = tpu.concatenate %75, %78 in 0 : vector<1x4xf32>, vector<1x4xf32> -> vector<2x4xf32>
    %c0_10 = arith.constant 0 : index
    %c0_11 = arith.constant 0 : index
    %c0_12 = arith.constant 0 : index
    %c0_13 = arith.constant 0 : index
    %80 = vector.load %arg5[%c0_10, %c0_11, %c0_12, %c0_13] : memref<1x1x2x4xf32, #tpu.memory_space<vmem>>, vector<1x1x2x4xf32>
    %81 = vector.shape_cast %80 : vector<1x1x2x4xf32> to vector<2x4xf32>
    %82 = vector.shape_cast %79 : vector<2x4xf32> to vector<1x1x2x4xf32>
    tpu.vector_store %arg5[%c0_10, %c0_11, %c0_12, %c0_13], %82 {strides = array<i32>} : memref<1x1x2x4xf32, #tpu.memory_space<vmem>>, vector<1x1x2x4xf32>,
    return
  }
  func.func @transform_0(%arg0: i32, %arg1: i32) -> (i32, i32, i32, i32) {
    %c0_i32 = arith.constant 0 : i32
    %c0_i32_0 = arith.constant 0 : i32
    %c0_i32_1 = arith.constant 0 : i32
    %c0_i32_2 = arith.constant 0 : i32
    return %arg0, %c0_i32, %c0_i32_0, %c0_i32_1 : i32, i32, i32, i32
  }
  func.func @transform_1(%arg0: i32, %arg1: i32) -> (i32, i32) {
    %c0_i32 = arith.constant 0 : i32
    %c0_i32_0 = arith.constant 0 : i32
    %c0_i32_1 = arith.constant 0 : i32
    return %c0_i32, %c0_i32_0 : i32, i32
  }
  func.func @transform_2(%arg0: i32, %arg1: i32) -> (i32, i32, i32, i32) {
    %c0_i32 = arith.constant 0 : i32
    %c0_i32_0 = arith.constant 0 : i32
    %c0_i32_1 = arith.constant 0 : i32
    return %arg0, %arg1, %c0_i32, %c0_i32_0 : i32, i32, i32, i32
  }
  func.func @transform_3(%arg0: i32, %arg1: i32) -> (i32, i32, i32, i32) {
    %c0_i32 = arith.constant 0 : i32
    %c0_i32_0 = arith.constant 0 : i32
    %c0_i32_1 = arith.constant 0 : i32
    return %arg0, %arg1, %c0_i32, %c0_i32_0 : i32, i32, i32, i32
  }
}

module attributes {stable_mosaic.version = 11 : i64} {
  func.func @_pointwise_stats_kernel(%arg0: i32, %arg1: i32, %arg2: memref<1x8x16x4xf32, #tpu.memory_space<vmem>>, %arg3: memref<2x4xf32, #tpu.memory_space<vmem>>, %arg4: memref<4x8xf32, #tpu.memory_space<vmem>>, %arg5: memref<1x8x16x8xf32, #tpu.memory_space<vmem>>, %arg6: memref<1x1x2x8xf32, #tpu.memory_space<vmem>>) attributes {dimension_semantics = [#tpu.dimension_semantics<parallel>, #tpu.dimension_semantics<parallel>], iteration_bounds = array<i64: 2, 2>, scalar_prefetch = 0 : i64, scratch_operands = 0 : i64, tpu.core_type = #tpu.core_type<tc>, window_params = [{transform_indices = @transform_0, window_bounds = array<i64: 1, 8, 16, 4>}, {pipeline_mode = #tpu.pipeline_mode<synchronous>, transform_indices = @transform_1, window_bounds = array<i64: 2, 4>}, {pipeline_mode = #tpu.pipeline_mode<synchronous>, transform_indices = @transform_2, window_bounds = array<i64: 4, 8>}, {transform_indices = @transform_3, window_bounds = array<i64: 1, 8, 16, 8>}, {transform_indices = @transform_4, window_bounds = array<i64: 1, 1, 2, 8>}]} {
    %c0 = arith.constant 0 : index
    %c0_0 = arith.constant 0 : index
    %c0_1 = arith.constant 0 : index
    %c0_2 = arith.constant 0 : index
    %0 = vector.load %arg2[%c0, %c0_0, %c0_1, %c0_2] : memref<1x8x16x4xf32, #tpu.memory_space<vmem>>, vector<1x8x16x4xf32>
    %1 = vector.shape_cast %0 : vector<1x8x16x4xf32> to vector<8x16x4xf32>
    %2 = vector.shape_cast %1 : vector<8x16x4xf32> to vector<128x4xf32>
    %c0_3 = arith.constant 0 : index
    %c0_4 = arith.constant 0 : index
    %3 = vector.load %arg3[%c0_3, %c0_4] : memref<2x4xf32, #tpu.memory_space<vmem>>, vector<2x4xf32>
    %4 = vector.extract_strided_slice %3 {offsets = [0, 0], sizes = [1, 4], strides = [1, 1]} : vector<2x4xf32> to vector<1x4xf32>
    %5 = vector.broadcast %4 : vector<1x4xf32> to vector<128x4xf32>
    %6 = arith.mulf %2, %5 : vector<128x4xf32>
    %7 = vector.extract_strided_slice %3 {offsets = [1, 0], sizes = [1, 4], strides = [1, 1]} : vector<2x4xf32> to vector<1x4xf32>
    %8 = vector.broadcast %7 : vector<1x4xf32> to vector<128x4xf32>
    %9 = arith.addf %6, %8 : vector<128x4xf32>
    %cst = arith.constant 0.000000e+00 : f32
    %10 = vector.broadcast %cst : f32 to vector<128x4xf32>
    %11 = arith.maximumf %9, %10 : vector<128x4xf32>
    %c0_5 = arith.constant 0 : index
    %c0_6 = arith.constant 0 : index
    %12 = vector.load %arg4[%c0_5, %c0_6] : memref<4x8xf32, #tpu.memory_space<vmem>>, vector<4x8xf32>
    %cst_7 = arith.constant dense<0.000000e+00> : vector<128x8xf32>
    %13 = tpu.matmul %11, %12, %cst_7 {dimension_numbers = #tpu.dot_dimension_numbers<[1], [0], [0], [1], [0, 0, 1, 1], [], []>} : vector<128x4xf32>, vector<4x8xf32>, vector<128x8xf32> -> vector<128x8xf32>
    %14 = vector.shape_cast %13 : vector<128x8xf32> to vector<8x16x8xf32>
    %c0_8 = arith.constant 0 : index
    %c0_9 = arith.constant 0 : index
    %c0_10 = arith.constant 0 : index
    %c0_11 = arith.constant 0 : index
    %15 = vector.load %arg5[%c0_8, %c0_9, %c0_10, %c0_11] : memref<1x8x16x8xf32, #tpu.memory_space<vmem>>, vector<1x8x16x8xf32>
    %16 = vector.shape_cast %15 : vector<1x8x16x8xf32> to vector<8x16x8xf32>
    %17 = vector.shape_cast %14 : vector<8x16x8xf32> to vector<1x8x16x8xf32>
    tpu.vector_store %arg5[%c0_8, %c0_9, %c0_10, %c0_11], %17 {strides = array<i32>} : memref<1x8x16x8xf32, #tpu.memory_space<vmem>>, vector<1x8x16x8xf32>,
    %cst_12 = arith.constant dense<0.000000e+00> : vector<8xf32>
    %18 = vector.multi_reduction <add>, %13, %cst_12 [0] : vector<128x8xf32> to vector<8xf32>
    %19 = vector.shape_cast %18 : vector<8xf32> to vector<1x8xf32>
    %20 = arith.mulf %13, %13 : vector<128x8xf32>
    %cst_13 = arith.constant dense<0.000000e+00> : vector<8xf32>
    %21 = vector.multi_reduction <add>, %20, %cst_13 [0] : vector<128x8xf32> to vector<8xf32>
    %22 = vector.shape_cast %21 : vector<8xf32> to vector<1x8xf32>
    %23 = tpu.concatenate %19, %22 in 0 : vector<1x8xf32>, vector<1x8xf32> -> vector<2x8xf32>
    %c0_14 = arith.constant 0 : index
    %c0_15 = arith.constant 0 : index
    %c0_16 = arith.constant 0 : index
    %c0_17 = arith.constant 0 : index
    %24 = vector.load %arg6[%c0_14, %c0_15, %c0_16, %c0_17] : memref<1x1x2x8xf32, #tpu.memory_space<vmem>>, vector<1x1x2x8xf32>
    %25 = vector.shape_cast %24 : vector<1x1x2x8xf32> to vector<2x8xf32>
    %26 = vector.shape_cast %23 : vector<2x8xf32> to vector<1x1x2x8xf32>
    tpu.vector_store %arg6[%c0_14, %c0_15, %c0_16, %c0_17], %26 {strides = array<i32>} : memref<1x1x2x8xf32, #tpu.memory_space<vmem>>, vector<1x1x2x8xf32>,
    return
  }
  func.func @transform_0(%arg0: i32, %arg1: i32) -> (i32, i32, i32, i32) {
    %c0_i32 = arith.constant 0 : i32
    %c0_i32_0 = arith.constant 0 : i32
    %c0_i32_1 = arith.constant 0 : i32
    return %arg0, %arg1, %c0_i32, %c0_i32_0 : i32, i32, i32, i32
  }
  func.func @transform_1(%arg0: i32, %arg1: i32) -> (i32, i32) {
    %c0_i32 = arith.constant 0 : i32
    %c0_i32_0 = arith.constant 0 : i32
    %c0_i32_1 = arith.constant 0 : i32
    return %c0_i32, %c0_i32_0 : i32, i32
  }
  func.func @transform_2(%arg0: i32, %arg1: i32) -> (i32, i32) {
    %c0_i32 = arith.constant 0 : i32
    %c0_i32_0 = arith.constant 0 : i32
    %c0_i32_1 = arith.constant 0 : i32
    return %c0_i32, %c0_i32_0 : i32, i32
  }
  func.func @transform_3(%arg0: i32, %arg1: i32) -> (i32, i32, i32, i32) {
    %c0_i32 = arith.constant 0 : i32
    %c0_i32_0 = arith.constant 0 : i32
    %c0_i32_1 = arith.constant 0 : i32
    return %arg0, %arg1, %c0_i32, %c0_i32_0 : i32, i32, i32, i32
  }
  func.func @transform_4(%arg0: i32, %arg1: i32) -> (i32, i32, i32, i32) {
    %c0_i32 = arith.constant 0 : i32
    %c0_i32_0 = arith.constant 0 : i32
    %c0_i32_1 = arith.constant 0 : i32
    return %arg0, %arg1, %c0_i32, %c0_i32_0 : i32, i32, i32, i32
  }
}

module attributes {stable_mosaic.version = 11 : i64} {
  func.func @_bn_relu_kernel(%arg0: i32, %arg1: i32, %arg2: memref<1x8x16x8xf32, #tpu.memory_space<vmem>>, %arg3: memref<2x8xf32, #tpu.memory_space<vmem>>, %arg4: memref<1x8x16x8xf32, #tpu.memory_space<vmem>>) attributes {dimension_semantics = [#tpu.dimension_semantics<parallel>, #tpu.dimension_semantics<parallel>], iteration_bounds = array<i64: 2, 2>, scalar_prefetch = 0 : i64, scratch_operands = 0 : i64, tpu.core_type = #tpu.core_type<tc>, window_params = [{transform_indices = @transform_0, window_bounds = array<i64: 1, 8, 16, 8>}, {pipeline_mode = #tpu.pipeline_mode<synchronous>, transform_indices = @transform_1, window_bounds = array<i64: 2, 8>}, {transform_indices = @transform_2, window_bounds = array<i64: 1, 8, 16, 8>}]} {
    %c0 = arith.constant 0 : index
    %c0_0 = arith.constant 0 : index
    %c0_1 = arith.constant 0 : index
    %c0_2 = arith.constant 0 : index
    %0 = vector.load %arg2[%c0, %c0_0, %c0_1, %c0_2] : memref<1x8x16x8xf32, #tpu.memory_space<vmem>>, vector<1x8x16x8xf32>
    %1 = vector.shape_cast %0 : vector<1x8x16x8xf32> to vector<8x16x8xf32>
    %2 = vector.shape_cast %1 : vector<8x16x8xf32> to vector<128x8xf32>
    %c0_3 = arith.constant 0 : index
    %c0_4 = arith.constant 0 : index
    %3 = vector.load %arg3[%c0_3, %c0_4] : memref<2x8xf32, #tpu.memory_space<vmem>>, vector<2x8xf32>
    %4 = vector.extract_strided_slice %3 {offsets = [0, 0], sizes = [1, 8], strides = [1, 1]} : vector<2x8xf32> to vector<1x8xf32>
    %5 = vector.broadcast %4 : vector<1x8xf32> to vector<128x8xf32>
    %6 = arith.mulf %2, %5 : vector<128x8xf32>
    %7 = vector.extract_strided_slice %3 {offsets = [1, 0], sizes = [1, 8], strides = [1, 1]} : vector<2x8xf32> to vector<1x8xf32>
    %8 = vector.broadcast %7 : vector<1x8xf32> to vector<128x8xf32>
    %9 = arith.addf %6, %8 : vector<128x8xf32>
    %cst = arith.constant 0.000000e+00 : f32
    %10 = vector.broadcast %cst : f32 to vector<128x8xf32>
    %11 = arith.maximumf %9, %10 : vector<128x8xf32>
    %12 = vector.shape_cast %11 : vector<128x8xf32> to vector<8x16x8xf32>
    %c0_5 = arith.constant 0 : index
    %c0_6 = arith.constant 0 : index
    %c0_7 = arith.constant 0 : index
    %c0_8 = arith.constant 0 : index
    %13 = vector.load %arg4[%c0_5, %c0_6, %c0_7, %c0_8] : memref<1x8x16x8xf32, #tpu.memory_space<vmem>>, vector<1x8x16x8xf32>
    %14 = vector.shape_cast %13 : vector<1x8x16x8xf32> to vector<8x16x8xf32>
    %15 = vector.shape_cast %12 : vector<8x16x8xf32> to vector<1x8x16x8xf32>
    tpu.vector_store %arg4[%c0_5, %c0_6, %c0_7, %c0_8], %15 {strides = array<i32>} : memref<1x8x16x8xf32, #tpu.memory_space<vmem>>, vector<1x8x16x8xf32>,
    return
  }
  func.func @transform_0(%arg0: i32, %arg1: i32) -> (i32, i32, i32, i32) {
    %c0_i32 = arith.constant 0 : i32
    %c0_i32_0 = arith.constant 0 : i32
    %c0_i32_1 = arith.constant 0 : i32
    return %arg0, %arg1, %c0_i32, %c0_i32_0 : i32, i32, i32, i32
  }
  func.func @transform_1(%arg0: i32, %arg1: i32) -> (i32, i32) {
    %c0_i32 = arith.constant 0 : i32
    %c0_i32_0 = arith.constant 0 : i32
    %c0_i32_1 = arith.constant 0 : i32
    return %c0_i32, %c0_i32_0 : i32, i32
  }
  func.func @transform_2(%arg0: i32, %arg1: i32) -> (i32, i32, i32, i32) {
    %c0_i32 = arith.constant 0 : i32
    %c0_i32_0 = arith.constant 0 : i32
    %c0_i32_1 = arith.constant 0 : i32
    return %arg0, %arg1, %c0_i32, %c0_i32_0 : i32, i32, i32, i32
  }
}

</mosaic_0001>

<bundles_post_ra>
// kernel: block_mobilenet_forward.5
= control target key start
LH: loop header
LB: loop body
LE: loop exit
PB: predicated region body
PF: predicated region fallthrough
CT: control target
= control target key end

     0   :  { %s487_s9 = smov 0   ;;  %s489_s10 = smov 0   ;;  %s629_s0 = inlined_call_operand.vmem [shape: f32[2,16,16,8], index: 0, kind: input, shape index: {}]   ;;  %s630_s1 = inlined_call_operand.vmem [shape: f32[2,8], index: 1, kind: input, shape index: {}]   ;;  %s631_s2 = inlined_call_operand.vmem [shape: f32[2,16,16,8], index: 2, kind: output, shape index: {}]  }
   0x1   :  { %s491_s11 = smov 0   ;;  %s493_s12 = smov 0  }
   0x2   :  { %s495_s13 = smov 0  }
   0x3 LB: > { %s21_s14 = sadd.s32 1, %s462_s11  ;;  %s24_s15 = sadd.s32 1, %s466_s12  ;;  %s470_s13 = sphi %s495_s13, %s12_s13   ;;  %s466_s12 = sphi %s493_s12, %s635_s12   ;;  %s462_s11 = sphi %s491_s11, %s634_s11   ;;  %s458_s10 = sphi %s489_s10, %s633_s10   ;;  %s454_s9 = sphi %s487_s9, %s632_s9  }
   0x4   : > { %p22_p0 = scmp.ge.s32.totalorder %s21_s14, 2  ;;  %p381_p1 = scmp.ge.s32.totalorder %s470_s13, 1 }
   0x5   : > { %p134_p2 = scmp.lt.s32.totalorder %s470_s13, 5 }
   0x6   : > { %s637_s14 = smov (%p22_p0, %s21_s14), 0  ;;  %s639_s15 = smov (!%p22_p0, %s24_s15), %s466_s12 }
   0x7   : > { %p135_p3 = pnand %p381_p1, %p134_p2  ;;  %p26_p4 = scmp.ge.s32.totalorder %s639_s15, 2 }
   0x8   : > { %s382_s16 = sshll.u32 (!%p135_p3), %s454_s9, 3  ;;  %p167_p5 = scmp.lt.s32.totalorder (!%p135_p3), %s458_s10, 1  ;;  %v205_v0 = vlaneseq (!%p135_p3)  ;;  %v204_v2 = vld [vmem:[%s630_s1] sm:$0x3] (!%p135_p3)  ;;  %vm261_vm0 = vcmask (!%p135_p3), 64512  }
   0x9   : > { %s641_s15 = smov (%p26_p4, %s639_s15), 0  ;;  %138 = sbr.rel (%p135_p3) target bundleno = 39 (0x27), region = 28 }
   0xa   : > { %p169_p6 = scmp.lt.s32.totalorder (!%p135_p3), %s382_s16, 15  ;;  %v206_v1 = vshrl.u32 (!%p135_p3), %v205_v0, 7 }
   0xc   : > { %v207_v3 = vsub.s32 (!%p135_p3), 0, %v206_v1  ;;  %v227_v4 = vsub.s32 (!%p135_p3), 1, %v206_v1 }
   0xe   : > { %v520_v5 = vrot.slane (!%p135_p3), %v204_v2, %v207_v3  ;;  %v527_v6 = vrot.slane (!%p135_p3), %v204_v2, %v227_v4 }
  0x10   : > { %s643_s10 = smov (!%p167_p5, %s458_s10), 1  ;;  %s645_s16 = smov (!%p169_p6, %s382_s16), 15 }
  0x11   : > { %s384_s19 = sshll.u32 %s643_s10, 5  ;;  %s383_s20 = sshll.u32 %s645_s16, 1 }
  0x12   : > { %s173_s21 = sadd.s32 %s384_s19, %s383_s20 }
  0x13   : > { %s385_s22 = sshll.u32 %s173_s21, 3 }
  0x14   : > { %s525_s25 = scalar_lea.vmem %s629_s0, %s385_s22  ;;  %s550_s28 = scalar_lea.vmem %s631_s2, %s385_s22 }
  0x15   : > { %v188_v7 = vld [vmem:[%s525_s25] sm:$0xff]  ;;  %v189_v8 = vld [vmem:[%s525_s25 + $0x8] sm:$0xff]  ;;  %v190_v9 = vld [vmem:[%s525_s25 + $0x10] sm:$0xff] }
  0x16   : > { %v209_v10 = vmul.f32 %v520_v5, %v188_v7  ;;  %v210_v11 = vmul.f32 %v520_v5, %v189_v8  ;;  %v211_v12 = vmul.f32 %v520_v5, %v190_v9  ;;  %v191_v13 = vld [vmem:[%s525_s25 + $0x18] sm:$0xff]  ;;  %v192_v14 = vld [vmem:[%s525_s25 + $0x20] sm:$0xff]  ;;  %v193_v15 = vld [vmem:[%s525_s25 + $0x28] sm:$0xff] }
  0x17   : > { %v212_v16 = vmul.f32 %v520_v5, %v191_v13  ;;  %v213_v17 = vmul.f32 %v520_v5, %v192_v14  ;;  %v214_v18 = vmul.f32 %v520_v5, %v193_v15  ;;  %v194_v19 = vld [vmem:[%s525_s25 + $0x30] sm:$0xff]  ;;  %v195_v20 = vld [vmem:[%s525_s25 + $0x38] sm:$0xff]  ;;  %v196_v29 = vld [vmem:[%s525_s25 + $0x40] sm:$0xff] }
  0x18   : > { %v229_v21 = vadd.f32 %v527_v6, %v209_v10  ;;  %v230_v22 = vadd.f32 %v527_v6, %v210_v11  ;;  %v231_v23 = vadd.f32 %v527_v6, %v211_v12  ;;  %v215_v24 = vmul.f32 %v520_v5, %v194_v19  ;;  %v197_v30 = vld [vmem:[%s525_s25 + $0x48] sm:$0xff]  ;;  %v198_v31 = vld [vmem:[%s525_s25 + $0x50] sm:$0xff]  ;;  %v199_v36 = vld [vmem:[%s525_s25 + $0x58] sm:$0xff] }
  0x19   : > { %v232_v25 = vadd.f32 %v527_v6, %v212_v16  ;;  %v233_v26 = vadd.f32 %v527_v6, %v213_v17  ;;  %v234_v27 = vadd.f32 %v527_v6, %v214_v18  ;;  %v216_v28 = vmul.f32 %v520_v5, %v195_v20  ;;  %v200_v37 = vld [vmem:[%s525_s25 + $0x60] sm:$0xff]  ;;  %v201_v38 = vld [vmem:[%s525_s25 + $0x68] sm:$0xff]  ;;  %v202_v43 = vld [vmem:[%s525_s25 + $0x70] sm:$0xff] }
  0x1a   : > { %v245_v32 = vmax.f32 %v229_v21, 0.0  ;;  %v246_v33 = vmax.f32 %v230_v22, 0.0  ;;  %v247_v34 = vmax.f32 %v231_v23, 0.0  ;;  %v235_v35 = vadd.f32 %v527_v6, %v215_v24  ;;  %v203_v48 = vld [vmem:[%s525_s25 + $0x78] sm:$0xff] }
  0x1b   : > { %v248_v39 = vmax.f32 %v232_v25, 0.0  ;;  %v249_v40 = vmax.f32 %v233_v26, 0.0  ;;  %v250_v41 = vmax.f32 %v234_v27, 0.0  ;;  %v236_v42 = vadd.f32 %v527_v6, %v216_v28 }
  0x1c   : > { %262 = vst.msk [vmem:[%s550_s28] sm:$0xff] %vm261_vm0, %v245_v32  ;;  %263 = vst.msk [vmem:[%s550_s28 + $0x8] sm:$0xff] %vm261_vm0, %v246_v33  ;;  %v251_v44 = vmax.f32 %v235_v35, 0.0  ;;  %v217_v45 = vmul.f32 %v520_v5, %v196_v29  ;;  %v218_v46 = vmul.f32 %v520_v5, %v197_v30  ;;  %v219_v47 = vmul.f32 %v520_v5, %v198_v31 }
  0x1d   : > { %264 = vst.msk [vmem:[%s550_s28 + $0x10] sm:$0xff] %vm261_vm0, %v247_v34  ;;  %265 = vst.msk [vmem:[%s550_s28 + $0x18] sm:$0xff] %vm261_vm0, %v248_v39  ;;  %v252_v49 = vmax.f32 %v236_v42, 0.0  ;;  %v220_v50 = vmul.f32 %v520_v5, %v199_v36  ;;  %v221_v51 = vmul.f32 %v520_v5, %v200_v37  ;;  %v222_v52 = vmul.f32 %v520_v5, %v201_v38 }
  0x1e   : > { %266 = vst.msk [vmem:[%s550_s28 + $0x20] sm:$0xff] %vm261_vm0, %v249_v40  ;;  %267 = vst.msk [vmem:[%s550_s28 + $0x28] sm:$0xff] %vm261_vm0, %v250_v41  ;;  %v237_v53 = vadd.f32 %v527_v6, %v217_v45  ;;  %v238_v54 = vadd.f32 %v527_v6, %v218_v46  ;;  %v239_v55 = vadd.f32 %v527_v6, %v219_v47 }
  0x1f   : > { %268 = vst.msk [vmem:[%s550_s28 + $0x30] sm:$0xff] %vm261_vm0, %v251_v44  ;;  %v223_v56 = vmul.f32 %v520_v5, %v202_v43  ;;  %269 = vst.msk [vmem:[%s550_s28 + $0x38] sm:$0xff] %vm261_vm0, %v252_v49  ;;  %v240_v57 = vadd.f32 %v527_v6, %v220_v50  ;;  %v241_v58 = vadd.f32 %v527_v6, %v221_v51 }
  0x20   : > { %v242_v59 = vadd.f32 %v527_v6, %v222_v52  ;;  %v224_v60 = vmul.f32 %v520_v5, %v203_v48  ;;  %v253_v61 = vmax.f32 %v237_v53, 0.0  ;;  %v254_v62 = vmax.f32 %v238_v54, 0.0 }
  0x21   : > { %v255_v63 = vmax.f32 %v239_v55, 0.0  ;;  %v243_v0 = vadd.f32 %v527_v6, %v223_v56  ;;  %v256_v1 = vmax.f32 %v240_v57, 0.0  ;;  %v257_v2 = vmax.f32 %v241_v58, 0.0 }
  0x22   : > { %v258_v3 = vmax.f32 %v242_v59, 0.0  ;;  %v244_v4 = vadd.f32 %v527_v6, %v224_v60  ;;  %270 = vst.msk [vmem:[%s550_s28 + $0x40] sm:$0xff] %vm261_vm0, %v253_v61  ;;  %271 = vst.msk [vmem:[%s550_s28 + $0x48] sm:$0xff] %vm261_vm0, %v254_v62 }
  0x23   : > { %272 = vst.msk [vmem:[%s550_s28 + $0x50] sm:$0xff] %vm261_vm0, %v255_v63  ;;  %v259_v7 = vmax.f32 %v243_v0, 0.0  ;;  %273 = vst.msk [vmem:[%s550_s28 + $0x58] sm:$0xff] %vm261_vm0, %v256_v1 }
  0x24   : > { %274 = vst.msk [vmem:[%s550_s28 + $0x60] sm:$0xff] %vm261_vm0, %v257_v2  ;;  %275 = vst.msk [vmem:[%s550_s28 + $0x68] sm:$0xff] %vm261_vm0, %v258_v3  ;;  %v260_v5 = vmax.f32 %v244_v4, 0.0 }
  0x25   : > { %276 = vst.msk [vmem:[%s550_s28 + $0x70] sm:$0xff] %vm261_vm0, %v259_v7 }
  0x26   : > { %277 = vst.msk [vmem:[%s550_s28 + $0x78] sm:$0xff] %vm261_vm0, %v260_v5 }
  0x27 PF: > { %s12_s13 = sadd.s32 1, %s470_s13   ;;  %s632_s9 = smov %s462_s11 }
  0x28   : > { %p9_p7 = scmp.ge.s32.totalorder %s12_s13, 6   ;;  %s633_s10 = smov %s466_s12 }
  0x29   : > { %s634_s11 = smov %s637_s14  ;;  %s635_s12 = smov %s641_s15 }
  0x2a   :  { %11 = sbr.rel (!%p9_p7) target bundleno = 3 (0x3), region = 58 }

// kernel: block_mobilenet_forward.4
= control target key start
LH: loop header
LB: loop body
LE: loop exit
PB: predicated region body
PF: predicated region fallthrough
CT: control target
= control target key end

     0   :  { %s976_s15 = smov 0   ;;  %s978_s16 = smov 0   ;;  %s1188_s0 = inlined_call_operand.vmem [shape: f32[2,16,16,4], index: 0, kind: input, shape index: {}]   ;;  %s1189_s1 = inlined_call_operand.vmem [shape: f32[2,4], index: 1, kind: input, shape index: {}]   ;;  %s1190_s2 = inlined_call_operand.vmem [shape: f32[4,8], index: 2, kind: input, shape index: {}]   ;;  %s1191_s3 = inlined_call_operand.vmem [shape: f32[2,16,16,8], index: 3, kind: output, shape index: {0}]   ;;  %s1192_s4 = inlined_call_operand.vmem [shape: f32[2,2,2,8], index: 4, kind: output, shape index: {1}]  }
   0x1   :  { %s980_s17 = smov 0   ;;  %s982_s18 = smov 0  }
   0x2   :  { %s984_s19 = smov 0  }
   0x3 LB: > { %s24_s20 = sadd.s32 1, %s941_s17  ;;  %s27_s21 = sadd.s32 1, %s945_s18  ;;  %s949_s19 = sphi %s984_s19, %s15_s19   ;;  %s945_s18 = sphi %s982_s18, %s1196_s18   ;;  %s941_s17 = sphi %s980_s17, %s1195_s17   ;;  %s937_s16 = sphi %s978_s16, %s1194_s16   ;;  %s933_s15 = sphi %s976_s15, %s1193_s15  }
   0x4   : > { %p25_p0 = scmp.ge.s32.totalorder %s24_s20, 2  ;;  %p796_p1 = scmp.ge.s32.totalorder %s949_s19, 1 }
   0x5   : > { %p189_p2 = scmp.lt.s32.totalorder %s949_s19, 5 }
   0x6   : > { %s1198_s20 = smov (%p25_p0, %s24_s20), 0  ;;  %s1200_s21 = smov (!%p25_p0, %s27_s21), %s945_s18 }
   0x7   : > { %p190_p3 = pnand %p796_p1, %p189_p2  ;;  %p29_p4 = scmp.ge.s32.totalorder %s1200_s21, 2 }
   0x8   : > { %v336_v0 = vld [vmem:[%s1190_s2] sm:$0xf] (!%p190_p3)  ;;  %vm386_vm0 = vcmask (!%p190_p3), 1043456   ;;  %s797_s24 = sshll.u32 (!%p190_p3), %s933_s15, 3  ;;  %p234_p5 = scmp.lt.s32.totalorder (!%p190_p3), %s937_s16, 1  ;;  %v280_v1 = vlaneseq (!%p190_p3)  ;;  %vm337_vm1 = vcmask (!%p190_p3), 31744  }
   0x9   : > { %s1202_s21 = smov (%p29_p4, %s1200_s21), 0  ;;  %193 = sbr.rel (%p190_p3) target bundleno = 291 (0x123), region = 32 }
   0xa   : > { %843 = vmatprep.subr.msk.mxu0 (!%p190_p3), %vm386_vm0, %v336_v0  ;;  %p236_p6 = scmp.lt.s32.totalorder (!%p190_p3), %s797_s24, 15  ;;  %869 = vmatprep.subr.msk.mxu1 (!%p190_p3), %vm386_vm0, %v336_v0  ;;  %v281_v2 = vshrl.u32 (!%p190_p3), %v280_v1, 7  ;;  %v279_v3 = vld [vmem:[%s1189_s1] sm:$0x3] (!%p190_p3)  ;;  %vm535_vm2 = vcmask (!%p190_p3), 64512   ;;  %p257_p7 = scmp.lt.s32.totalorder (!%p190_p3), %s933_s15, 1 }
   0xb   : > { %844 = vmatpush3.msk.msra.mxu0 (!%p190_p3), %vm386_vm0, %v336_v0  ;;  %870 = vmatpush3.msk.msra.mxu1 (!%p190_p3), %vm386_vm0, %v336_v0  ;;  %vm642_vm3 = vcmask (!%p190_p3), 1040384   ;;  %vm644_vm4 = vcmask (!%p190_p3), 58368  }
   0xc   : > { %v282_v4 = vsub.s32 (!%p190_p3), 0, %v281_v2  ;;  %v302_v5 = vsub.s32 (!%p190_p3), 1, %v281_v2 }
   0xe   : > { %v1020_v6 = vrot.slane (!%p190_p3), %v279_v3, %v282_v4  ;;  %v1030_v7 = vrot.slane (!%p190_p3), %v279_v3, %v302_v5 }
  0x10   : > { %s1204_s16 = smov (!%p234_p5, %s937_s16), 1  ;;  %s1206_s24 = smov (!%p236_p6, %s797_s24), 15 }
  0x11   : > { %s799_s27 = sshll.u32 %s1204_s16, 5  ;;  %s798_s28 = sshll.u32 %s1206_s24, 1 }
  0x12   : > { %s1018_s29 = sadd.s32 %s799_s27, %s798_s28  ;;  %s1208_s15 = smov (!%p257_p7, %s933_s15), 1 }
  0x13   : > { %s800_s30 = sshll.u32 %s1018_s29, 3  ;;  %s805_s11 = sshll.u32 %s1204_s16, 1 }
  0x14   : > { %s1028_s7 = scalar_lea.vmem %s1188_s0, %s800_s30  ;;  %s1101_s10 = scalar_lea.vmem %s1191_s3, %s800_s30 }
  0x15   : > { %v263_v8 = vld [vmem:[%s1028_s7] sm:$0xff]  ;;  %v264_v9 = vld [vmem:[%s1028_s7 + $0x8] sm:$0xff]  ;;  %v265_v10 = vld [vmem:[%s1028_s7 + $0x10] sm:$0xff]  ;;  %s260_s12 = sadd.s32 %s805_s11, %s1208_s15 }
  0x16   : > { %v284_v11 = vmul.f32 %v1020_v6, %v263_v8  ;;  %v285_v12 = vmul.f32 %v1020_v6, %v264_v9  ;;  %v286_v13 = vmul.f32 %v1020_v6, %v265_v10  ;;  %v266_v14 = vld [vmem:[%s1028_s7 + $0x18] sm:$0xff]  ;;  %v267_v15 = vld [vmem:[%s1028_s7 + $0x20] sm:$0xff]  ;;  %v268_v16 = vld [vmem:[%s1028_s7 + $0x28] sm:$0xff]  ;;  %s806_s13 = sshll.u32 %s260_s12, 1 }
  0x17   : > { %v287_v17 = vmul.f32 %v1020_v6, %v266_v14  ;;  %v288_v18 = vmul.f32 %v1020_v6, %v267_v15  ;;  %v289_v19 = vmul.f32 %v1020_v6, %v268_v16  ;;  %v269_v20 = vld [vmem:[%s1028_s7 + $0x30] sm:$0xff]  ;;  %v270_v24 = vld [vmem:[%s1028_s7 + $0x38] sm:$0xff]  ;;  %v271_v27 = vld [vmem:[%s1028_s7 + $0x40] sm:$0xff]  ;;  %s262_s23 = scalar_lea.vmem %s1192_s4, %s806_s13 }
  0x18   : > { %v304_v21 = vadd.f32 %v1030_v7, %v284_v11  ;;  %v305_v22 = vadd.f32 %v1030_v7, %v285_v12  ;;  %v306_v23 = vadd.f32 %v1030_v7, %v286_v13  ;;  %v290_v26 = vmul.f32 %v1020_v6, %v269_v20  ;;  %v272_v28 = vld [vmem:[%s1028_s7 + $0x48] sm:$0xff]  ;;  %v273_v29 = vld [vmem:[%s1028_s7 + $0x50] sm:$0xff]  ;;  %v274_v34 = vld [vmem:[%s1028_s7 + $0x58] sm:$0xff] }
  0x19   : > { %v307_v25 = vadd.f32 %v1030_v7, %v287_v17  ;;  %v308_v33 = vadd.f32 %v1030_v7, %v288_v18  ;;  %v275_v35 = vld [vmem:[%s1028_s7 + $0x60] sm:$0xff]  ;;  %v309_v36 = vadd.f32 %v1030_v7, %v289_v19  ;;  %v291_v37 = vmul.f32 %v1020_v6, %v270_v24  ;;  %v276_v41 = vld [vmem:[%s1028_s7 + $0x68] sm:$0xff]  ;;  %v277_v42 = vld [vmem:[%s1028_s7 + $0x70] sm:$0xff] }
  0x1a   : > { %v320_v30 = vmax.f32 %v304_v21, 0.0  ;;  %v321_v31 = vmax.f32 %v305_v22, 0.0  ;;  %v322_v32 = vmax.f32 %v306_v23, 0.0  ;;  %v292_v38 = vmul.f32 %v1020_v6, %v271_v27  ;;  %v278_v58 = vld [vmem:[%s1028_s7 + $0x78] sm:$0xff] }
  0x1b   : > { %v293_v39 = vmul.f32 %v1020_v6, %v272_v28  ;;  %v294_v40 = vmul.f32 %v1020_v6, %v273_v29  ;;  %v323_v43 = vmax.f32 %v307_v25, 0.0  ;;  %v310_v44 = vadd.f32 %v1030_v7, %v290_v26 }
  0x1c   : > { %845 = vmatprep.mubr.msk.f32.mxu0 %vm337_vm1, %v320_v30  ;;  %v295_v45 = vmul.f32 %v1020_v6, %v274_v34  ;;  %v296_v46 = vmul.f32 %v1020_v6, %v275_v35  ;;  %v324_v47 = vmax.f32 %v308_v33, 0.0  ;;  %v312_v48 = vadd.f32 %v1030_v7, %v292_v38 }
  0x1d   : > { %846 = vmatmul.mubr.msk.f32.vlgmr.msra.gmra.mrb[0].mxu0 %vm337_vm1, %v321_v31  ;;  %v313_v49 = vadd.f32 %v1030_v7, %v293_v39  ;;  %v314_v50 = vadd.f32 %v1030_v7, %v294_v40  ;;  %v297_v52 = vmul.f32 %v1020_v6, %v276_v41  ;;  %v298_v53 = vmul.f32 %v1020_v6, %v277_v42 }
  0x1e   : > { %848 = vmatprep.mubr.msk.f32.mxu0 %vm337_vm1, %v322_v32  ;;  %v315_v51 = vadd.f32 %v1030_v7, %v295_v45  ;;  %v328_v54 = vmax.f32 %v312_v48, 0.0  ;;  %v316_v57 = vadd.f32 %v1030_v7, %v296_v46  ;;  %v325_v59 = vmax.f32 %v309_v36, 0.0 }
  0x1f   : > { %v329_v55 = vmax.f32 %v313_v49, 0.0  ;;  %v330_v56 = vmax.f32 %v314_v50, 0.0  ;;  %v311_v60 = vadd.f32 %v1030_v7, %v291_v37  ;;  %v326_v61 = vmax.f32 %v310_v44, 0.0 }
  0x20   : > { %857 = vmatprep.mubr.msk.f32.mxu1 %vm337_vm1, %v328_v54  ;;  %v331_v62 = vmax.f32 %v315_v51, 0.0  ;;  %v317_v63 = vadd.f32 %v1030_v7, %v297_v52  ;;  %v299_v0 = vmul.f32 %v1020_v6, %v278_v58  ;;  %v332_v1 = vmax.f32 %v316_v57, 0.0 }
  0x21   : > { %849 = vmatmul.mubr.msk.f32.gmra.mrb[2].mxu0 %vm337_vm1, %v323_v43  ;;  %858 = vmatmul.mubr.msk.f32.vlgmr.msra.gmra.mrb[0].mxu1 %vm337_vm1, %v329_v55  ;;  %v318_v2 = vadd.f32 %v1030_v7, %v298_v53  ;;  %v327_v3 = vmax.f32 %v311_v60, 0.0 }
  0x22   : > { %851 = vmatprep.mubr.msk.f32.mxu0 %vm337_vm1, %v324_v47  ;;  %860 = vmatprep.mubr.msk.f32.mxu1 %vm337_vm1, %v330_v56  ;;  %v333_v4 = vmax.f32 %v317_v63, 0.0  ;;  %v319_v5 = vadd.f32 %v1030_v7, %v299_v0 }
  0x23   : > { %v334_v8 = vmax.f32 %v318_v2, 0.0 }
  0x24   : > { %v335_v6 = vmax.f32 %v319_v5, 0.0 }
  0x25   : > { %852 = vmatmul.mubr.msk.f32.gmra.mrb[4].mxu0 %vm337_vm1, %v325_v59  ;;  %861 = vmatmul.mubr.msk.f32.gmra.mrb[2].mxu1 %vm337_vm1, %v331_v62 }
  0x26   : > { %854 = vmatprep.mubr.msk.f32.mxu0 %vm337_vm1, %v326_v61  ;;  %863 = vmatprep.mubr.msk.f32.mxu1 %vm337_vm1, %v332_v1 }
  0x29   : > { %855 = vmatmul.mubr.msk.f32.gmra.mrb[6].mxu0 %vm337_vm1, %v327_v3  ;;  %864 = vmatmul.mubr.msk.f32.gmra.mrb[4].mxu1 %vm337_vm1, %v333_v4 }
  0x2a   : > { %866 = vmatprep.mubr.msk.f32.mxu1 %vm337_vm1, %v334_v8 }
  0x2d   : > { %867 = vmatmul.mubr.msk.f32.gmra.mrb[6].mxu1 %vm337_vm1, %v335_v6 }
  0xf0   : > { %v847_v7 = vpop.f32.mrb[0].mxu0 }
  0xf1   : > { %537 = vst.msk [vmem:[%s1101_s10 + $0x8] sm:$0xff] %vm535_vm2, %v847_v7  ;;  %v553_v9 = vsel %vm535_vm2, %v847_v7, 0.0  ;;  %v590_v10 = vmul.f32 %v847_v7, %v847_v7  ;;  %v456_v11 = vpop.f32.mrb[1].mxu0 }
  0xf2   : > { %536 = vst.msk [vmem:[%s1101_s10] sm:$0xff] %vm535_vm2, %v456_v11  ;;  %v552_v12 = vsel %vm535_vm2, %v456_v11, 0.0  ;;  %v589_v13 = vmul.f32 %v456_v11, %v456_v11 }
  0xf3   : > { %v606_v14 = vsel %vm535_vm2, %v590_v10, 0.0  ;;  %v554_v15 = vadd.f32 %v553_v9, %v552_v12 }
  0xf4   : > { %v605_v16 = vsel %vm535_vm2, %v589_v13, 0.0  ;;  %v850_v17 = vpop.f32.mrb[2].mxu0  ;;  %v859_v23 = vpop.f32.mrb[0].mxu1 }
  0xf5   : > { %v607_v18 = vadd.f32 %v606_v14, %v605_v16  ;;  %539 = vst.msk [vmem:[%s1101_s10 + $0x18] sm:$0xff] %vm535_vm2, %v850_v17  ;;  %v466_v19 = vpop.f32.mrb[3].mxu0  ;;  %v592_v20 = vmul.f32 %v850_v17, %v850_v17  ;;  %545 = vst.msk [vmem:[%s1101_s10 + $0x48] sm:$0xff] %vm535_vm2, %v859_v23  ;;  %v496_v25 = vpop.f32.mrb[1].mxu1  ;;  %v557_v26 = vsel %vm535_vm2, %v850_v17, 0.0  ;;  %v598_v61 = vmul.f32 %v859_v23, %v859_v23 }
  0xf6   : > { %538 = vst.msk [vmem:[%s1101_s10 + $0x10] sm:$0xff] %vm535_vm2, %v466_v19  ;;  %v555_v21 = vsel %vm535_vm2, %v466_v19, 0.0  ;;  %v591_v22 = vmul.f32 %v466_v19, %v466_v19  ;;  %544 = vst.msk [vmem:[%s1101_s10 + $0x40] sm:$0xff] %vm535_vm2, %v496_v25  ;;  %v597_v46 = vmul.f32 %v496_v25, %v496_v25  ;;  %v567_v57 = vsel %vm535_vm2, %v496_v25, 0.0 }
  0xf7   : > { %v556_v24 = vadd.f32 %v555_v21, %v554_v15  ;;  %v610_v32 = vsel %vm535_vm2, %v592_v20, 0.0  ;;  %v569_v4 = vsel %vm535_vm2, %v859_v23, 0.0  ;;  %v622_v7 = vsel %vm535_vm2, %v598_v61, 0.0 }
  0xf8   : > { %v608_v27 = vsel %vm535_vm2, %v591_v22, 0.0  ;;  %v853_v28 = vpop.f32.mrb[4].mxu0  ;;  %v862_v36 = vpop.f32.mrb[2].mxu1  ;;  %v620_v62 = vsel %vm535_vm2, %v597_v46, 0.0 }
  0xf9   : > { %v609_v29 = vadd.f32 %v608_v27, %v607_v18  ;;  %541 = vst.msk [vmem:[%s1101_s10 + $0x28] sm:$0xff] %vm535_vm2, %v853_v28  ;;  %v476_v30 = vpop.f32.mrb[5].mxu0  ;;  %v558_v31 = vadd.f32 %v557_v26, %v556_v24  ;;  %v594_v33 = vmul.f32 %v853_v28, %v853_v28  ;;  %547 = vst.msk [vmem:[%s1101_s10 + $0x58] sm:$0xff] %vm535_vm2, %v862_v36  ;;  %v506_v39 = vpop.f32.mrb[3].mxu1  ;;  %v561_v40 = vsel %vm535_vm2, %v853_v28, 0.0 }
  0xfa   : > { %540 = vst.msk [vmem:[%s1101_s10 + $0x20] sm:$0xff] %vm535_vm2, %v476_v30  ;;  %v559_v34 = vsel %vm535_vm2, %v476_v30, 0.0  ;;  %v593_v35 = vmul.f32 %v476_v30, %v476_v30  ;;  %546 = vst.msk [vmem:[%s1101_s10 + $0x50] sm:$0xff] %vm535_vm2, %v506_v39  ;;  %v599_v63 = vmul.f32 %v506_v39, %v506_v39  ;;  %v571_v5 = vsel %vm535_vm2, %v506_v39, 0.0 }
  0xfb   : > { %v560_v37 = vadd.f32 %v559_v34, %v558_v31  ;;  %v611_v38 = vadd.f32 %v610_v32, %v609_v29  ;;  %v614_v47 = vsel %vm535_vm2, %v594_v33, 0.0  ;;  %v600_v9 = vmul.f32 %v862_v36, %v862_v36 }
  0xfc   : > { %v612_v41 = vsel %vm535_vm2, %v593_v35, 0.0  ;;  %v856_v42 = vpop.f32.mrb[6].mxu0  ;;  %v865_v51 = vpop.f32.mrb[4].mxu1  ;;  %v624_v10 = vsel %vm535_vm2, %v599_v63, 0.0  ;;  %v573_v14 = vsel %vm535_vm2, %v862_v36, 0.0 }
  0xfd   : > { %v613_v43 = vadd.f32 %v612_v41, %v611_v38  ;;  %543 = vst.msk [vmem:[%s1101_s10 + $0x38] sm:$0xff] %vm535_vm2, %v856_v42  ;;  %v486_v44 = vpop.f32.mrb[7].mxu0  ;;  %v562_v45 = vadd.f32 %v561_v40, %v560_v37  ;;  %v596_v48 = vmul.f32 %v856_v42, %v856_v42  ;;  %549 = vst.msk [vmem:[%s1101_s10 + $0x68] sm:$0xff] %vm535_vm2, %v865_v51  ;;  %v516_v54 = vpop.f32.mrb[5].mxu1  ;;  %v565_v55 = vsel %vm535_vm2, %v856_v42, 0.0 }
  0xfe   : > { %542 = vst.msk [vmem:[%s1101_s10 + $0x30] sm:$0xff] %vm535_vm2, %v486_v44  ;;  %v563_v49 = vsel %vm535_vm2, %v486_v44, 0.0  ;;  %v595_v50 = vmul.f32 %v486_v44, %v486_v44  ;;  %548 = vst.msk [vmem:[%s1101_s10 + $0x60] sm:$0xff] %vm535_vm2, %v516_v54  ;;  %v601_v11 = vmul.f32 %v516_v54, %v516_v54  ;;  %v575_v15 = vsel %vm535_vm2, %v516_v54, 0.0 }
  0xff   : > { %v564_v52 = vadd.f32 %v563_v49, %v562_v45  ;;  %v615_v53 = vadd.f32 %v614_v47, %v613_v43  ;;  %v618_v60 = vsel %vm535_vm2, %v596_v48, 0.0  ;;  %v626_v18 = vsel %vm535_vm2, %v600_v9, 0.0 }
 0x100   : > { %v616_v56 = vsel %vm535_vm2, %v595_v50, 0.0  ;;  %v868_v0 = vpop.f32.mrb[6].mxu1  ;;  %v602_v19 = vmul.f32 %v865_v51, %v865_v51  ;;  %v628_v20 = vsel %vm535_vm2, %v601_v11, 0.0  ;;  %v577_v24 = vsel %vm535_vm2, %v865_v51, 0.0 }
 0x101   : > { %v566_v58 = vadd.f32 %v565_v55, %v564_v52  ;;  %v617_v59 = vadd.f32 %v616_v56, %v615_v53  ;;  %551 = vst.msk [vmem:[%s1101_s10 + $0x78] sm:$0xff] %vm535_vm2, %v868_v0  ;;  %v526_v3 = vpop.f32.mrb[7].mxu1  ;;  %v604_v29 = vmul.f32 %v868_v0, %v868_v0  ;;  %v581_v33 = vsel %vm535_vm2, %v868_v0, 0.0 }
 0x102   : > { %550 = vst.msk [vmem:[%s1101_s10 + $0x70] sm:$0xff] %vm535_vm2, %v526_v3  ;;  %v603_v21 = vmul.f32 %v526_v3, %v526_v3  ;;  %v579_v25 = vsel %vm535_vm2, %v526_v3, 0.0  ;;  %v630_v28 = vsel %vm535_vm2, %v602_v19, 0.0 }
 0x103   : > { %v619_v1 = vadd.f32 %v618_v60, %v617_v59  ;;  %v568_v2 = vadd.f32 %v567_v57, %v566_v58  ;;  %v634_v36 = vsel %vm535_vm2, %v604_v29, 0.0 }
 0x104   : > { %v632_v30 = vsel %vm535_vm2, %v603_v21, 0.0 }
 0x105   : > { %v621_v8 = vadd.f32 %v620_v62, %v619_v1  ;;  %v570_v6 = vadd.f32 %v569_v4, %v568_v2 }
 0x107   : > { %v572_v12 = vadd.f32 %v571_v5, %v570_v6  ;;  %v623_v13 = vadd.f32 %v622_v7, %v621_v8 }
 0x109   : > { %v625_v16 = vadd.f32 %v624_v10, %v623_v13  ;;  %v574_v17 = vadd.f32 %v573_v14, %v572_v12 }
 0x10b   : > { %v576_v22 = vadd.f32 %v575_v15, %v574_v17  ;;  %v627_v23 = vadd.f32 %v626_v18, %v625_v16 }
 0x10d   : > { %v629_v26 = vadd.f32 %v628_v20, %v627_v23  ;;  %v578_v27 = vadd.f32 %v577_v24, %v576_v22 }
 0x10f   : > { %v580_v31 = vadd.f32 %v579_v25, %v578_v27  ;;  %v631_v32 = vadd.f32 %v630_v28, %v629_v26 }
 0x111   : > { %v582_v34 = vadd.f32 %v581_v33, %v580_v31  ;;  %v633_v35 = vadd.f32 %v632_v30, %v631_v32 }
 0x113   : > { %v583_v37 = vrot.slane %v582_v34, 4  ;;  %v635_v38 = vadd.f32 %v634_v36, %v633_v35 }
 0x115   : > { %v584_v39 = vadd.f32 %v583_v37, %v582_v34  ;;  %v636_v40 = vrot.slane %v635_v38, 4 }
 0x117   : > { %v585_v41 = vrot.slane %v584_v39, 2  ;;  %v637_v42 = vadd.f32 %v636_v40, %v635_v38 }
 0x119   : > { %v586_v43 = vadd.f32 %v585_v41, %v584_v39  ;;  %v638_v44 = vrot.slane %v637_v42, 2 }
 0x11b   : > { %v587_v45 = vrot.slane %v586_v43, 1  ;;  %v639_v46 = vadd.f32 %v638_v44, %v637_v42 }
 0x11d   : > { %v640_v47 = vrot.slane %v639_v46, 1  ;;  %v588_v48 = vadd.f32 %v587_v45, %v586_v43 }
 0x11f   : > { %v641_v49 = vadd.f32 %v640_v47, %v639_v46 }
 0x121   : > { %v643_v50 = vsel %vm642_vm3, %v588_v48, %v641_v49 }
 0x122   : > { %645 = vst.msk [vmem:[%s262_s23] sm:$0x3] %vm644_vm4, %v643_v50 }
 0x123 PF: > { %s15_s19 = sadd.s32 1, %s949_s19   ;;  %s1193_s15 = smov %s941_s17 }
 0x124   : > { %p12_p8 = scmp.ge.s32.totalorder %s15_s19, 6   ;;  %s1194_s16 = smov %s945_s18 }
 0x125   : > { %s1195_s17 = smov %s1198_s20  ;;  %s1196_s18 = smov %s1202_s21 }
 0x126   :  { %14 = sbr.rel (!%p12_p8) target bundleno = 3 (0x3), region = 74 }

// kernel: block_mobilenet_forward.3
= control target key start
LH: loop header
LB: loop body
LE: loop exit
PB: predicated region body
PF: predicated region fallthrough
CT: control target
= control target key end

     0   :  { %s1481_s12 = smov 0   ;;  %s1483_s13 = smov 0   ;;  %s2228_s0 = inlined_call_operand.vmem [shape: f32[2,20,20,4], index: 0, kind: input, shape index: {}]   ;;  %s2229_s1 = inlined_call_operand.vmem [shape: f32[9,4], index: 1, kind: input, shape index: {}]   ;;  %s2230_s2 = inlined_call_operand.vmem [shape: f32[2,16,16,4], index: 2, kind: output, shape index: {0}]   ;;  %s2231_s3 = inlined_call_operand.vmem [shape: f32[2,2,2,4], index: 3, kind: output, shape index: {1}]  }
   0x1   :  { %s1485_s14 = smov 0   ;;  %s1487_s15 = smov 0  }
   0x2   :  { %s1489_s16 = smov 0  }
   0x3 LB: > { %s23_s17 = sadd.s32 1, %s1451_s14  ;;  %s26_s18 = sadd.s32 1, %s1455_s15  ;;  %s1459_s16 = sphi %s1489_s16, %s14_s16   ;;  %s1455_s15 = sphi %s1487_s15, %s2236_s15   ;;  %s1451_s14 = sphi %s1485_s14, %s2235_s14   ;;  %s1447_s13 = sphi %s1483_s13, %s2234_s13   ;;  %s1443_s12 = sphi %s1481_s12, %s2233_s12  }
   0x4   : > { %p24_p0 = scmp.ge.s32.totalorder %s23_s17, 2  ;;  %p1366_p1 = scmp.ge.s32.totalorder %s1459_s16, 1 }
   0x5   : > { %p156_p2 = scmp.lt.s32.totalorder %s1459_s16, 5 }
   0x6   : > { %s2238_s17 = smov (%p24_p0, %s23_s17), 0  ;;  %s2240_s18 = smov (!%p24_p0, %s26_s18), %s1455_s15 }
   0x7   : > { %p157_p3 = pnand %p1366_p1, %p156_p2  ;;  %p28_p4 = scmp.ge.s32.totalorder %s2240_s18, 2 }
   0x8   : > { %p193_p5 = scmp.lt.s32.totalorder (!%p157_p3), %s1447_s13, 1  ;;  %v258_v0 = vlaneseq (!%p157_p3)  ;;  %s1375_s19 = smul.u32 (!%p157_p3), 192, %s1443_s12  ;;  %v256_v2 = vld [vmem:[%s2229_s1] sm:$0xff] (!%p157_p3)  ;;  %vm346_vm0 = vcmask (!%p157_p3), 1045504   ;;  %vm471_vm1 = vcmask (!%p157_p3), 1043456   ;;  %vm1112_vm2 = vcmask (!%p157_p3), 31744  }
   0x9   : > { %s2242_s18 = smov (%p28_p4, %s2240_s18), 0  ;;  %160 = sbr.rel (%p157_p3) target bundleno = 208 (0xd0), region = 28 }
   0xa   : > { %v259_v1 = vshrl.u32 (!%p157_p3), %v258_v0, 7  ;;  %s1368_s26 = sshll.u32 (!%p157_p3), %s1443_s12, 3  ;;  %v1578_v37 = vld [vmem:[%s2229_s1 + $0x8] ss:$0 sm:$0xff] (!%p157_p3)  ;;  %p211_p7 = scmp.lt.s32.totalorder (!%p157_p3), %s1443_s12, 1  ;;  %vm1219_vm3 = vcmask (!%p157_p3), 1040384  }
   0xb   : > { %p1556_p6 = scmp.lt.s32.totalorder (!%p157_p3), %s1368_s26, 15  ;;  %vm1221_vm4 = vcmask (!%p157_p3), 25600  }
   0xc   : > { %v260_v3 = vsub.s32 (!%p157_p3), 0, %v259_v1  ;;  %v296_v4 = vsub.s32 (!%p157_p3), 1, %v259_v1  ;;  %v421_v5 = vsub.s32 (!%p157_p3), 2, %v259_v1  ;;  %v546_v6 = vsub.s32 (!%p157_p3), 3, %v259_v1 }
   0xd   : > { %v582_v7 = vsub.s32 (!%p157_p3), 4, %v259_v1  ;;  %v706_v8 = vsub.s32 (!%p157_p3), 5, %v259_v1  ;;  %v830_v9 = vsub.s32 (!%p157_p3), 6, %v259_v1  ;;  %v866_v10 = vsub.s32 (!%p157_p3), 7, %v259_v1 }
   0xe   : > { %v1523_v11 = vrot.slane (!%p157_p3), %v256_v2, %v260_v3  ;;  %v1525_v12 = vrot.slane (!%p157_p3), %v256_v2, %v296_v4  ;;  %v1527_v13 = vrot.slane (!%p157_p3), %v256_v2, %v421_v5  ;;  %v1529_v14 = vrot.slane (!%p157_p3), %v256_v2, %v546_v6 }
   0xf   : > { %v1534_v15 = vrot.slane (!%p157_p3), %v256_v2, %v582_v7  ;;  %v1536_v16 = vrot.slane (!%p157_p3), %v256_v2, %v706_v8  ;;  %v1543_v20 = vrot.slane (!%p157_p3), %v256_v2, %v830_v9  ;;  %v1545_v21 = vrot.slane (!%p157_p3), %v256_v2, %v866_v10 }
  0x10   : > { %s2244_s13 = smov (!%p193_p5, %s1447_s13), 1  ;;  %s2246_s26 = smov (!%p1556_p6, %s1368_s26), 15 }
  0x11   : > { %s1379_s22 = smul.u32 480, %s2244_s13  ;;  %s1369_s4 = sshll.u32 %s2246_s26, 1 }
  0x12   : > { %s1370_s5 = sshll.u32 %s2244_s13, 5  ;;  %s2248_s12 = smov (!%p211_p7, %s1443_s12), 1 }
  0x13   : > { %s197_s25 = scalar_lea.vmem %s2228_s0, %s1379_s22  ;;  %s1626_s6 = sadd.s32 %s1370_s5, %s1369_s4 }
  0x14   : > { %s1532_s27 = scalar_lea.vmem %s197_s25, %s1375_s19  ;;  %s1371_s7 = sshll.u32 %s1626_s6, 3 }
  0x15   : > { %v220_v17 = vld [vmem:[%s1532_s27] sm:$0xff]  ;;  %v221_v18 = vld [vmem:[%s1532_s27 + $0x8] sm:$0xff]  ;;  %v1541_v19 = vld [vmem:[%s1532_s27 + $0x30] sm:$0xff]  ;;  %s1658_s10 = scalar_lea.vmem %s2230_s2, %s1371_s7  ;;  %s1372_s20 = sshll.u32 %s2244_s13, 1 }
  0x16   : > { %v1548_v22 = vld [vmem:[%s1532_s27 + $0x38] sm:$0xff]  ;;  %v262_v23 = vmul.f32 %v1523_v11, %v220_v17  ;;  %v298_v24 = vmul.f32 %v1525_v12, %v220_v17  ;;  %v299_v25 = vmul.f32 %v1525_v12, %v221_v18  ;;  %v423_v26 = vmul.f32 %v1527_v13, %v220_v17  ;;  %v1561_v27 = vld [vmem:[%s1532_s27 + $0x60] sm:$0xff]  ;;  %v1573_v36 = vld [vmem:[%s1532_s27 + $0x68] sm:$0xff]  ;;  %s214_s21 = sadd.s32 %s1372_s20, %s2248_s12 }
  0x17   : > { %v424_v28 = vmul.f32 %v1527_v13, %v221_v18  ;;  %v548_v29 = vmul.f32 %v1529_v14, %v1541_v19  ;;  %v584_v30 = vmul.f32 %v1534_v15, %v1541_v19  ;;  %v585_v31 = vmul.f32 %v1534_v15, %v1548_v22  ;;  %v222_v46 = vld [vmem:[%s1532_s27 + $0x10] sm:$0xf]  ;;  %v1603_v55 = vld [vmem:[%s1532_s27 + $0x40] sm:$0xf]  ;;  %s1373_s22 = sshll.u32 %s214_s21, 1 }
  0x18   : > { %v347_v32 = vrot.slane %v298_v24, 2  ;;  %v348_v33 = vrot.slane %v299_v25, 2  ;;  %v472_v34 = vrot.slane %v423_v26, 4  ;;  %v708_v35 = vmul.f32 %v1536_v16, %v1541_v19  ;;  %v1612_v1 = vld [vmem:[%s1532_s27 + $0x70] sm:$0xf]  ;;  %s216_s25 = scalar_lea.vmem %s2231_s3, %s1373_s22 }
  0x19   : > { %v473_v38 = vrot.slane %v424_v28, 4  ;;  %v632_v39 = vrot.slane %v584_v30, 2  ;;  %v633_v40 = vrot.slane %v585_v31, 2  ;;  %v709_v41 = vmul.f32 %v1536_v16, %v1548_v22 }
  0x1a   : > { %v349_v42 = vsel %vm346_vm0, %v347_v32, %v348_v33  ;;  %v756_v43 = vrot.slane %v708_v35, 4  ;;  %v832_v44 = vmul.f32 %v1543_v20, %v1561_v27  ;;  %v868_v45 = vmul.f32 %v1545_v21, %v1561_v27 }
  0x1b   : > { %v403_v47 = vadd.f32 %v349_v42, %v262_v23  ;;  %v474_v48 = vsel %vm471_vm1, %v472_v34, %v473_v38  ;;  %v634_v49 = vsel %vm346_vm0, %v632_v39, %v633_v40  ;;  %v757_v50 = vrot.slane %v709_v41, 4  ;;  %v223_v23 = vld [vmem:[%s1532_s27 + $0x18] sm:$0xff] }
  0x1c   : > { %v869_v51 = vmul.f32 %v1545_v21, %v1573_v36  ;;  %v916_v52 = vrot.slane %v868_v45, 2  ;;  %v992_v53 = vmul.f32 %v1578_v37, %v1561_v27  ;;  %v993_v54 = vmul.f32 %v1578_v37, %v1573_v36 }
  0x1d   : > { %v528_v56 = vadd.f32 %v474_v48, %v403_v47  ;;  %v758_v57 = vsel %vm471_vm1, %v756_v43, %v757_v50  ;;  %v263_v58 = vmul.f32 %v1523_v11, %v221_v18  ;;  %v300_v59 = vmul.f32 %v1525_v12, %v222_v46  ;;  %v1640_v43 = vld [vmem:[%s1532_s27 + $0x48] sm:$0xff]  ;;  %v1648_v48 = vld [vmem:[%s1532_s27 + $0x50] sm:$0xff] }
  0x1e   : > { %v917_v60 = vrot.slane %v869_v51, 2  ;;  %v1040_v61 = vrot.slane %v992_v53, 4  ;;  %v1041_v62 = vrot.slane %v993_v54, 4  ;;  %v425_v63 = vmul.f32 %v1527_v13, %v222_v46 }
  0x1f   : > { %v564_v0 = vadd.f32 %v548_v29, %v528_v56  ;;  %v350_v2 = vrot.slane %v300_v59, 2  ;;  %v549_v3 = vmul.f32 %v1529_v14, %v1548_v22  ;;  %v586_v4 = vmul.f32 %v1534_v15, %v1603_v55  ;;  %v224_v29 = vld [vmem:[%s1532_s27 + $0x20] sm:$0xff] }
  0x20   : > { %v918_v5 = vsel %vm346_vm0, %v916_v52, %v917_v60  ;;  %v1042_v6 = vsel %vm471_vm1, %v1040_v61, %v1041_v62  ;;  %v475_v7 = vrot.slane %v425_v63, 4  ;;  %v710_v8 = vmul.f32 %v1536_v16, %v1603_v55 }
  0x21   : > { %v688_v9 = vadd.f32 %v634_v49, %v564_v0  ;;  %v351_v10 = vsel %vm346_vm0, %v348_v33, %v350_v2  ;;  %v635_v17 = vrot.slane %v586_v4, 2  ;;  %v833_v18 = vmul.f32 %v1543_v20, %v1573_v36 }
  0x22   : > { %v404_v24 = vadd.f32 %v351_v10, %v263_v58  ;;  %v476_v25 = vsel %vm471_vm1, %v473_v38, %v475_v7  ;;  %v759_v26 = vrot.slane %v710_v8, 4  ;;  %v870_v28 = vmul.f32 %v1545_v21, %v1612_v1  ;;  %v1682_v7 = vld [vmem:[%s1532_s27 + $0x80] sm:$0xff] }
  0x23   : > { %v812_v30 = vadd.f32 %v758_v57, %v688_v9  ;;  %v636_v31 = vsel %vm346_vm0, %v633_v40, %v635_v17  ;;  %v994_v32 = vmul.f32 %v1578_v37, %v1612_v1  ;;  %v264_v33 = vmul.f32 %v1523_v11, %v223_v23 }
  0x24   : > { %v529_v34 = vadd.f32 %v476_v25, %v404_v24  ;;  %v760_v35 = vsel %vm471_vm1, %v757_v50, %v759_v26  ;;  %v919_v39 = vrot.slane %v870_v28, 2  ;;  %v301_v38 = vmul.f32 %v1525_v12, %v223_v23 }
  0x25   : > { %v848_v41 = vadd.f32 %v832_v44, %v812_v30  ;;  %v1043_v42 = vrot.slane %v994_v32, 4  ;;  %v1643_v45 = vmul.f32 %v1525_v12, %v224_v29  ;;  %v426_v40 = vmul.f32 %v1527_v13, %v223_v23 }
  0x26   : > { %v565_v46 = vadd.f32 %v549_v3, %v529_v34  ;;  %v920_v47 = vsel %vm346_vm0, %v917_v60, %v919_v39  ;;  %v352_v49 = vrot.slane %v301_v38, 2  ;;  %v1651_v50 = vmul.f32 %v1527_v13, %v224_v29  ;;  %v1666_v60 = vld [vmem:[%s1532_s27 + $0x78] sm:$0xff]  ;;  %v225_v34 = vld [vmem:[%s1532_s27 + $0x28] sm:$0xf] }
  0x27   : > { %v972_v51 = vadd.f32 %v918_v5, %v848_v41  ;;  %v1044_v44 = vsel %vm471_vm1, %v1041_v62, %v1043_v42  ;;  %v353_v52 = vrot.slane %v1643_v45, 2  ;;  %v477_v53 = vrot.slane %v426_v40, 4 }
  0x28   : > { %v689_v54 = vadd.f32 %v636_v31, %v565_v46  ;;  %v478_v56 = vrot.slane %v1651_v50, 4  ;;  %v550_v57 = vmul.f32 %v1529_v14, %v1640_v43  ;;  %v587_v58 = vmul.f32 %v1534_v15, %v1640_v43  ;;  %v1703_v50 = vld [vmem:[%s1532_s27 + $0x58] sm:$0xf] }
  0x29   : > { %v1096_v59 = vadd.f32 %v1042_v6, %v972_v51  ;;  %v354_v61 = vsel %vm346_vm0, %v352_v49, %v353_v52  ;;  %v1673_v62 = vmul.f32 %v1534_v15, %v1648_v48  ;;  %v711_v63 = vmul.f32 %v1536_v16, %v1640_v43 }
  0x2a   : > { %v813_v0 = vadd.f32 %v760_v35, %v689_v54  ;;  %v405_v2 = vadd.f32 %v354_v61, %v264_v33  ;;  %v479_v3 = vsel %vm471_vm1, %v477_v53, %v478_v56  ;;  %v637_v4 = vrot.slane %v587_v58, 2 }
  0x2b   : > { %1113 = vst.msk [vmem:[%s1658_s10] sm:$0xff] %vm1112_vm2, %v1096_v59  ;;  %v1129_v5 = vsel %vm1112_vm2, %v1096_v59, 0.0  ;;  %v1166_v6 = vmul.f32 %v1096_v59, %v1096_v59  ;;  %v638_v8 = vrot.slane %v1673_v62, 2  ;;  %v712_v9 = vmul.f32 %v1536_v16, %v1648_v48 }
  0x2c   : > { %v849_v10 = vadd.f32 %v833_v18, %v813_v0  ;;  %v530_v17 = vadd.f32 %v479_v3, %v405_v2  ;;  %v761_v23 = vrot.slane %v711_v63, 4  ;;  %v834_v24 = vmul.f32 %v1543_v20, %v1666_v60  ;;  %v1716_v3 = vld [vmem:[%s1532_s27 + $0x88] sm:$0xf] }
  0x2d   : > { %v1182_v25 = vsel %vm1112_vm2, %v1166_v6, 0.0  ;;  %v639_v26 = vsel %vm346_vm0, %v637_v4, %v638_v8  ;;  %v762_v28 = vrot.slane %v712_v9, 4  ;;  %v871_v30 = vmul.f32 %v1545_v21, %v1666_v60 }
  0x2e   : > { %v973_v31 = vadd.f32 %v920_v47, %v849_v10  ;;  %v566_v32 = vadd.f32 %v550_v57, %v530_v17  ;;  %v872_v33 = vmul.f32 %v1545_v21, %v1682_v7  ;;  %v995_v18 = vmul.f32 %v1578_v37, %v1666_v60 }
  0x2f   : > { %v763_v35 = vsel %vm471_vm1, %v761_v23, %v762_v28  ;;  %v921_v39 = vrot.slane %v871_v30, 2  ;;  %v996_v38 = vmul.f32 %v1578_v37, %v1682_v7  ;;  %v265_v41 = vmul.f32 %v1523_v11, %v224_v29 }
  0x30   : > { %v1097_v42 = vadd.f32 %v1044_v44, %v973_v31  ;;  %v690_v40 = vadd.f32 %v639_v26, %v566_v32  ;;  %v922_v46 = vrot.slane %v872_v33, 2  ;;  %v1045_v47 = vrot.slane %v995_v18, 4 }
  0x31   : > { %v1046_v49 = vrot.slane %v996_v38, 4  ;;  %v303_v51 = vmul.f32 %v1525_v12, %v225_v34  ;;  %v428_v53 = vmul.f32 %v1527_v13, %v225_v34  ;;  %v551_v54 = vmul.f32 %v1529_v14, %v1648_v48 }
  0x32   : > { %1114 = vst.msk [vmem:[%s1658_s10 + $0x8] sm:$0xff] %vm1112_vm2, %v1097_v42  ;;  %v1130_v57 = vsel %vm1112_vm2, %v1097_v42, 0.0  ;;  %v1167_v29 = vmul.f32 %v1097_v42, %v1097_v42  ;;  %v814_v44 = vadd.f32 %v763_v35, %v690_v40  ;;  %v923_v58 = vsel %vm346_vm0, %v921_v39, %v922_v46 }
  0x33   : > { %v1131_v59 = vadd.f32 %v1130_v57, %v1129_v5  ;;  %v1047_v61 = vsel %vm471_vm1, %v1045_v47, %v1046_v49  ;;  %v355_v62 = vrot.slane %v303_v51, 2  ;;  %v480_v63 = vrot.slane %v428_v53, 4 }
  0x34   : > { %v1183_v0 = vsel %vm1112_vm2, %v1167_v29, 0.0  ;;  %v850_v2 = vadd.f32 %v834_v24, %v814_v44  ;;  %v589_v4 = vmul.f32 %v1534_v15, %v1703_v50  ;;  %v713_v6 = vmul.f32 %v1536_v16, %v1703_v50  ;;  %v1752_v44 = vld [vmem:[%s1532_s27 + $0x90] sm:$0xff] }
  0x35   : > { %v1184_v9 = vadd.f32 %v1183_v0, %v1182_v25  ;;  %v356_v5 = vsel %vm346_vm0, %v353_v52, %v355_v62  ;;  %v481_v10 = vsel %vm471_vm1, %v478_v56, %v480_v63  ;;  %v835_v17 = vmul.f32 %v1543_v20, %v1682_v7 }
  0x36   : > { %v974_v23 = vadd.f32 %v923_v58, %v850_v2  ;;  %v406_v24 = vadd.f32 %v356_v5, %v265_v41  ;;  %v640_v26 = vrot.slane %v589_v4, 2  ;;  %v764_v30 = vrot.slane %v713_v6, 4 }
  0x37   : > { %v873_v31 = vmul.f32 %v1545_v21, %v1716_v3  ;;  %v997_v25 = vmul.f32 %v1578_v37, %v1716_v3  ;;  %v266_v45 = vmul.f32 %v1523_v11, %v1541_v19  ;;  %v304_v52 = vmul.f32 %v1525_v12, %v1541_v19 }
  0x38   : > { %v1098_v56 = vadd.f32 %v1047_v61, %v974_v23  ;;  %v531_v32 = vadd.f32 %v481_v10, %v406_v24  ;;  %v641_v33 = vsel %vm346_vm0, %v638_v8, %v640_v26  ;;  %v765_v18 = vsel %vm471_vm1, %v762_v28, %v764_v30 }
  0x39   : > { %v924_v34 = vrot.slane %v873_v31, 2  ;;  %v1048_v35 = vrot.slane %v997_v25, 4  ;;  %v1740_v39 = vmul.f32 %v1525_v12, %v1548_v22  ;;  %v357_v38 = vrot.slane %v304_v52, 2 }
  0x3a   : > { %1115 = vst.msk [vmem:[%s1658_s10 + $0x10] sm:$0xff] %vm1112_vm2, %v1098_v56  ;;  %v1132_v41 = vsel %vm1112_vm2, %v1098_v56, 0.0  ;;  %v1168_v42 = vmul.f32 %v1098_v56, %v1098_v56  ;;  %v567_v40 = vadd.f32 %v551_v54, %v531_v32  ;;  %v429_v8 = vmul.f32 %v1527_v13, %v1541_v19 }
  0x3b   : > { %v1133_v47 = vadd.f32 %v1132_v41, %v1131_v59  ;;  %v925_v28 = vsel %vm346_vm0, %v922_v46, %v924_v34  ;;  %v1049_v51 = vsel %vm471_vm1, %v1046_v49, %v1048_v35  ;;  %v358_v53 = vrot.slane %v1740_v39, 2  ;;  %v1762_v59 = vld [vmem:[%s1532_s27 + $0x98] sm:$0xff] }
  0x3c   : > { %v1185_v57 = vsel %vm1112_vm2, %v1168_v42, 0.0  ;;  %v691_v29 = vadd.f32 %v641_v33, %v567_v40  ;;  %v430_v58 = vmul.f32 %v1527_v13, %v1548_v22  ;;  %v482_v54 = vrot.slane %v429_v8, 4 }
  0x3d   : > { %v1186_v61 = vadd.f32 %v1185_v57, %v1184_v9  ;;  %v359_v62 = vsel %vm346_vm0, %v357_v38, %v358_v53  ;;  %v552_v19 = vmul.f32 %v1529_v14, %v1561_v27  ;;  %v590_v46 = vmul.f32 %v1534_v15, %v1561_v27 }
  0x3e   : > { %v815_v49 = vadd.f32 %v765_v18, %v691_v29  ;;  %v407_v63 = vadd.f32 %v359_v62, %v266_v45  ;;  %v483_v0 = vrot.slane %v430_v58, 4  ;;  %v591_v2 = vmul.f32 %v1534_v15, %v1573_v36 }
  0x3f   : > { %v642_v4 = vrot.slane %v590_v46, 2  ;;  %v714_v6 = vmul.f32 %v1536_v16, %v1561_v27  ;;  %v715_v9 = vmul.f32 %v1536_v16, %v1573_v36  ;;  %v836_v5 = vmul.f32 %v1543_v20, %v1752_v44  ;;  %v1797_v46 = vld [vmem:[%s1532_s27 + $0xa0] sm:$0xf] }
  0x40   : > { %v851_v10 = vadd.f32 %v835_v17, %v815_v49  ;;  %v484_v23 = vsel %vm471_vm1, %v482_v54, %v483_v0  ;;  %v643_v24 = vrot.slane %v591_v2, 2  ;;  %v874_v26 = vmul.f32 %v1545_v21, %v1752_v44 }
  0x41   : > { %v532_v30 = vadd.f32 %v484_v23, %v407_v63  ;;  %v766_v31 = vrot.slane %v714_v6, 4  ;;  %v767_v25 = vrot.slane %v715_v9, 4  ;;  %v875_v45 = vmul.f32 %v1545_v21, %v1762_v59 }
  0x42   : > { %v975_v52 = vadd.f32 %v925_v28, %v851_v10  ;;  %v644_v56 = vsel %vm346_vm0, %v642_v4, %v643_v24  ;;  %v926_v32 = vrot.slane %v874_v26, 2  ;;  %v998_v17 = vmul.f32 %v1578_v37, %v1752_v44 }
  0x43   : > { %v568_v33 = vadd.f32 %v552_v19, %v532_v30  ;;  %v768_v18 = vsel %vm471_vm1, %v766_v31, %v767_v25  ;;  %v927_v34 = vrot.slane %v875_v45, 2  ;;  %v999_v35 = vmul.f32 %v1578_v37, %v1762_v59 }
  0x44   : > { %v1099_v39 = vadd.f32 %v1049_v51, %v975_v52  ;;  %v1050_v38 = vrot.slane %v998_v17, 4  ;;  %v267_v41 = vmul.f32 %v1523_v11, %v1548_v22  ;;  %v306_v42 = vmul.f32 %v1525_v12, %v1603_v55 }
  0x45   : > { %v692_v40 = vadd.f32 %v644_v56, %v568_v33  ;;  %v928_v8 = vsel %vm346_vm0, %v926_v32, %v927_v34  ;;  %v1051_v28 = vrot.slane %v999_v35, 4  ;;  %v431_v57 = vmul.f32 %v1527_v13, %v1603_v55 }
  0x46   : > { %1116 = vst.msk [vmem:[%s1658_s10 + $0x18] sm:$0xff] %vm1112_vm2, %v1099_v39  ;;  %v1134_v29 = vsel %vm1112_vm2, %v1099_v39, 0.0  ;;  %v1169_v51 = vmul.f32 %v1099_v39, %v1099_v39  ;;  %v360_v58 = vrot.slane %v306_v42, 2  ;;  %v553_v54 = vmul.f32 %v1529_v14, %v1573_v36 }
  0x47   : > { %v1135_v22 = vadd.f32 %v1134_v29, %v1133_v47  ;;  %v816_v62 = vadd.f32 %v768_v18, %v692_v40  ;;  %v1052_v19 = vsel %vm471_vm1, %v1050_v38, %v1051_v28  ;;  %v485_v49 = vrot.slane %v431_v57, 4 }
  0x48   : > { %v1187_v63 = vsel %vm1112_vm2, %v1169_v51, 0.0  ;;  %v361_v55 = vsel %vm346_vm0, %v358_v53, %v360_v58  ;;  %v592_v2 = vmul.f32 %v1534_v15, %v1612_v1  ;;  %v716_v4 = vmul.f32 %v1536_v16, %v1612_v1 }
  0x49   : > { %v1188_v6 = vadd.f32 %v1187_v63, %v1186_v61  ;;  %v852_v9 = vadd.f32 %v836_v5, %v816_v62  ;;  %v408_v10 = vadd.f32 %v361_v55, %v267_v41  ;;  %v486_v47 = vsel %vm471_vm1, %v483_v0, %v485_v49  ;;  %v1844_v63 = vld [vmem:[%s1532_s27 + $0xb0] sm:$0xff] }
  0x4a   : > { %v645_v23 = vrot.slane %v592_v2, 2  ;;  %v769_v26 = vrot.slane %v716_v4, 4  ;;  %v837_v30 = vmul.f32 %v1543_v20, %v1762_v59  ;;  %v876_v31 = vmul.f32 %v1545_v21, %v1797_v46 }
  0x4b   : > { %v976_v53 = vadd.f32 %v928_v8, %v852_v9  ;;  %v533_v45 = vadd.f32 %v486_v47, %v408_v10  ;;  %v1000_v52 = vmul.f32 %v1578_v37, %v1797_v46  ;;  %v268_v61 = vmul.f32 %v1523_v11, %v1640_v43 }
  0x4c   : > { %v646_v5 = vsel %vm346_vm0, %v643_v24, %v645_v23  ;;  %v770_v0 = vsel %vm471_vm1, %v767_v25, %v769_v26  ;;  %v929_v56 = vrot.slane %v876_v31, 2  ;;  %v307_v32 = vmul.f32 %v1525_v12, %v1640_v43 }
  0x4d   : > { %v1100_v17 = vadd.f32 %v1052_v19, %v976_v53  ;;  %v569_v33 = vadd.f32 %v553_v54, %v533_v45  ;;  %v1053_v18 = vrot.slane %v1000_v52, 4  ;;  %v1820_v35 = vmul.f32 %v1525_v12, %v1648_v48  ;;  %v1837_v54 = vld [vmem:[%s1532_s27 + $0xa8] sm:$0xff] }
  0x4e   : > { %v930_v39 = vsel %vm346_vm0, %v927_v34, %v929_v56  ;;  %v362_v38 = vrot.slane %v307_v32, 2  ;;  %v432_v24 = vmul.f32 %v1527_v13, %v1640_v43  ;;  %v1827_v25 = vmul.f32 %v1527_v13, %v1648_v48 }
  0x4f   : > { %1117 = vst.msk [vmem:[%s1658_s10 + $0x20] sm:$0xff] %vm1112_vm2, %v1100_v17  ;;  %v1136_v41 = vsel %vm1112_vm2, %v1100_v17, 0.0  ;;  %v1170_v42 = vmul.f32 %v1100_v17, %v1100_v17  ;;  %v693_v40 = vadd.f32 %v646_v5, %v569_v33  ;;  %v1054_v8 = vsel %vm471_vm1, %v1051_v28, %v1053_v18 }
  0x50   : > { %v1137_v57 = vadd.f32 %v1136_v41, %v1135_v22  ;;  %v363_v34 = vrot.slane %v1820_v35, 2  ;;  %v487_v29 = vrot.slane %v432_v24, 4  ;;  %v488_v51 = vrot.slane %v1827_v25, 4 }
  0x51   : > { %v1189_v43 = vsel %vm1112_vm2, %v1170_v42, 0.0  ;;  %v817_v58 = vadd.f32 %v770_v0, %v693_v40  ;;  %v554_v62 = vmul.f32 %v1529_v14, %v1666_v60  ;;  %v593_v19 = vmul.f32 %v1534_v15, %v1666_v60 }
  0x52   : > { %v1190_v49 = vadd.f32 %v1189_v43, %v1188_v6  ;;  %v364_v28 = vsel %vm346_vm0, %v362_v38, %v363_v34  ;;  %v489_v22 = vsel %vm471_vm1, %v487_v29, %v488_v51  ;;  %v594_v55 = vmul.f32 %v1534_v15, %v1682_v7 }
  0x53   : > { %v853_v2 = vadd.f32 %v837_v30, %v817_v58  ;;  %v409_v4 = vadd.f32 %v364_v28, %v268_v61  ;;  %v647_v9 = vrot.slane %v593_v19, 2  ;;  %v717_v10 = vmul.f32 %v1536_v16, %v1666_v60 }
  0x54   : > { %v648_v47 = vrot.slane %v594_v55, 2  ;;  %v718_v23 = vmul.f32 %v1536_v16, %v1682_v7  ;;  %v838_v6 = vmul.f32 %v1543_v20, %v1837_v54  ;;  %v877_v26 = vmul.f32 %v1545_v21, %v1837_v54 }
  0x55   : > { %v977_v31 = vadd.f32 %v930_v39, %v853_v2  ;;  %v534_v53 = vadd.f32 %v489_v22, %v409_v4  ;;  %v771_v45 = vrot.slane %v717_v10, 4  ;;  %v878_v30 = vmul.f32 %v1545_v21, %v1844_v63 }
  0x56   : > { %v649_v52 = vsel %vm346_vm0, %v647_v9, %v648_v47  ;;  %v772_v61 = vrot.slane %v718_v23, 4  ;;  %v931_v5 = vrot.slane %v877_v26, 2  ;;  %v1001_v0 = vmul.f32 %v1578_v37, %v1837_v54 }
  0x57   : > { %v1101_v56 = vadd.f32 %v1054_v8, %v977_v31  ;;  %v570_v32 = vadd.f32 %v554_v62, %v534_v53  ;;  %v932_v17 = vrot.slane %v878_v30, 2  ;;  %v1002_v33 = vmul.f32 %v1578_v37, %v1844_v63  ;;  %v1878_v62 = vld [vmem:[%s1532_s27 + $0xb8] sm:$0xf] }
  0x58   : > { %v773_v18 = vsel %vm471_vm1, %v771_v45, %v772_v61  ;;  %v1055_v35 = vrot.slane %v1001_v0, 4  ;;  %v269_v39 = vmul.f32 %v1523_v11, %v1648_v48  ;;  %v309_v38 = vmul.f32 %v1525_v12, %v1703_v50 }
  0x59   : > { %1118 = vst.msk [vmem:[%s1658_s10 + $0x28] sm:$0xff] %vm1112_vm2, %v1101_v56  ;;  %v1138_v24 = vsel %vm1112_vm2, %v1101_v56, 0.0  ;;  %v1171_v25 = vmul.f32 %v1101_v56, %v1101_v56  ;;  %v694_v41 = vadd.f32 %v649_v52, %v570_v32  ;;  %v933_v42 = vsel %vm346_vm0, %v931_v5, %v932_v17 }
  0x5a   : > { %v1139_v40 = vadd.f32 %v1138_v24, %v1137_v57  ;;  %v1056_v8 = vrot.slane %v1002_v33, 4  ;;  %v365_v29 = vrot.slane %v309_v38, 2  ;;  %v434_v43 = vmul.f32 %v1527_v13, %v1703_v50 }
  0x5b   : > { %v1191_v58 = vsel %vm1112_vm2, %v1171_v25, 0.0  ;;  %v818_v48 = vadd.f32 %v773_v18, %v694_v41  ;;  %v555_v19 = vmul.f32 %v1529_v14, %v1682_v7  ;;  %v595_v28 = vmul.f32 %v1534_v15, %v1716_v3 }
  0x5c   : > { %v1192_v22 = vadd.f32 %v1191_v58, %v1190_v49  ;;  %v1057_v55 = vsel %vm471_vm1, %v1055_v35, %v1056_v8  ;;  %v366_v57 = vsel %vm346_vm0, %v363_v34, %v365_v29  ;;  %v490_v2 = vrot.slane %v434_v43, 4  ;;  %v1919_v43 = vld [vmem:[%s1532_s27 + $0xc0] sm:$0xff] }
  0x5d   : > { %v854_v4 = vadd.f32 %v838_v6, %v818_v48  ;;  %v410_v9 = vadd.f32 %v366_v57, %v269_v39  ;;  %v650_v50 = vrot.slane %v595_v28, 2  ;;  %v719_v10 = vmul.f32 %v1536_v16, %v1716_v3 }
  0x5e   : > { %v491_v23 = vsel %vm471_vm1, %v488_v51, %v490_v2  ;;  %v839_v26 = vmul.f32 %v1543_v20, %v1844_v63  ;;  %v879_v31 = vmul.f32 %v1545_v21, %v1878_v62  ;;  %v1003_v49 = vmul.f32 %v1578_v37, %v1878_v62  ;;  %v1927_v2 = vld [vmem:[%s1532_s27 + $0xc8] sm:$0xff] }
  0x5f   : > { %v978_v53 = vadd.f32 %v933_v42, %v854_v4  ;;  %v535_v34 = vadd.f32 %v491_v23, %v410_v9  ;;  %v651_v6 = vsel %vm346_vm0, %v648_v47, %v650_v50  ;;  %v774_v45 = vrot.slane %v719_v10, 4 }
  0x60   : > { %v934_v30 = vrot.slane %v879_v31, 2  ;;  %v1058_v52 = vrot.slane %v1003_v49, 4  ;;  %v270_v51 = vmul.f32 %v1523_v11, %v1561_v27  ;;  %v310_v5 = vmul.f32 %v1525_v12, %v1561_v27 }
  0x61   : > { %v1102_v0 = vadd.f32 %v1057_v55, %v978_v53  ;;  %v571_v56 = vadd.f32 %v555_v19, %v535_v34  ;;  %v775_v32 = vsel %vm471_vm1, %v772_v61, %v774_v45  ;;  %v1903_v33 = vmul.f32 %v1525_v12, %v1573_v36 }
  0x62   : > { %v935_v47 = vsel %vm346_vm0, %v932_v17, %v934_v30  ;;  %v1059_v18 = vsel %vm471_vm1, %v1056_v8, %v1058_v52  ;;  %v367_v35 = vrot.slane %v310_v5, 2  ;;  %v435_v39 = vmul.f32 %v1527_v13, %v1561_v27 }
  0x63   : > { %1119 = vst.msk [vmem:[%s1658_s10 + $0x30] sm:$0xff] %vm1112_vm2, %v1102_v0  ;;  %v1140_v38 = vsel %vm1112_vm2, %v1102_v0, 0.0  ;;  %v1172_v24 = vmul.f32 %v1102_v0, %v1102_v0  ;;  %v695_v25 = vadd.f32 %v651_v6, %v571_v56  ;;  %v368_v61 = vrot.slane %v1903_v33, 2 }
  0x64   : > { %v1141_v41 = vadd.f32 %v1140_v38, %v1139_v40  ;;  %v436_v42 = vmul.f32 %v1527_v13, %v1573_v36  ;;  %v492_v17 = vrot.slane %v435_v39, 4  ;;  %v556_v8 = vmul.f32 %v1529_v14, %v1752_v44 }
  0x65   : > { %v1193_v29 = vsel %vm1112_vm2, %v1172_v24, 0.0  ;;  %v819_v27 = vadd.f32 %v775_v32, %v695_v25  ;;  %v369_v58 = vsel %vm346_vm0, %v367_v35, %v368_v61  ;;  %v596_v48 = vmul.f32 %v1534_v15, %v1752_v44 }
  0x66   : > { %v1194_v19 = vadd.f32 %v1193_v29, %v1192_v22  ;;  %v411_v28 = vadd.f32 %v369_v58, %v270_v51  ;;  %v493_v40 = vrot.slane %v436_v42, 4  ;;  %v597_v55 = vmul.f32 %v1534_v15, %v1762_v59  ;;  %v1959_v58 = vld [vmem:[%s1532_s27 + $0xd0] sm:$0xf] }
  0x67   : > { %v855_v57 = vadd.f32 %v839_v26, %v819_v27  ;;  %v652_v4 = vrot.slane %v596_v48, 2  ;;  %v720_v9 = vmul.f32 %v1536_v16, %v1752_v44  ;;  %v721_v50 = vmul.f32 %v1536_v16, %v1762_v59 }
  0x68   : > { %v494_v10 = vsel %vm471_vm1, %v492_v17, %v493_v40  ;;  %v653_v23 = vrot.slane %v597_v55, 2  ;;  %v840_v22 = vmul.f32 %v1543_v20, %v1919_v43  ;;  %v880_v31 = vmul.f32 %v1545_v21, %v1919_v43 }
  0x69   : > { %v979_v49 = vadd.f32 %v935_v47, %v855_v57  ;;  %v536_v26 = vadd.f32 %v494_v10, %v411_v28  ;;  %v776_v53 = vrot.slane %v720_v9, 4  ;;  %v777_v34 = vrot.slane %v721_v50, 4 }
  0x6a   : > { %v654_v6 = vsel %vm346_vm0, %v652_v4, %v653_v23  ;;  %v881_v45 = vmul.f32 %v1545_v21, %v1927_v2  ;;  %v936_v30 = vrot.slane %v880_v31, 2  ;;  %v1004_v52 = vmul.f32 %v1578_v37, %v1919_v43 }
  0x6b   : > { %v1103_v51 = vadd.f32 %v1059_v18, %v979_v49  ;;  %v572_v5 = vadd.f32 %v556_v8, %v536_v26  ;;  %v778_v0 = vsel %vm471_vm1, %v776_v53, %v777_v34  ;;  %v1005_v56 = vmul.f32 %v1578_v37, %v1927_v2 }
  0x6c   : > { %v937_v32 = vrot.slane %v881_v45, 2  ;;  %v1060_v33 = vrot.slane %v1004_v52, 4  ;;  %v271_v47 = vmul.f32 %v1523_v11, %v1573_v36  ;;  %v312_v35 = vmul.f32 %v1525_v12, %v1612_v1 }
  0x6d   : > { %1120 = vst.msk [vmem:[%s1658_s10 + $0x38] sm:$0xff] %vm1112_vm2, %v1103_v51  ;;  %v1142_v39 = vsel %vm1112_vm2, %v1103_v51, 0.0  ;;  %v1173_v18 = vmul.f32 %v1103_v51, %v1103_v51  ;;  %v696_v38 = vadd.f32 %v654_v6, %v572_v5  ;;  %v1061_v24 = vrot.slane %v1005_v56, 4 }
  0x6e   : > { %v1143_v25 = vadd.f32 %v1142_v39, %v1141_v41  ;;  %v938_v42 = vsel %vm346_vm0, %v936_v30, %v937_v32  ;;  %v370_v17 = vrot.slane %v312_v35, 2  ;;  %v437_v8 = vmul.f32 %v1527_v13, %v1612_v1 }
  0x6f   : > { %v1195_v29 = vsel %vm1112_vm2, %v1173_v18, 0.0  ;;  %v820_v36 = vadd.f32 %v778_v0, %v696_v38  ;;  %v1062_v27 = vsel %vm471_vm1, %v1060_v33, %v1061_v24  ;;  %v557_v48 = vmul.f32 %v1529_v14, %v1762_v59 }
  0x70   : > { %v1196_v28 = vadd.f32 %v1195_v29, %v1194_v19  ;;  %v371_v55 = vsel %vm346_vm0, %v368_v61, %v370_v17  ;;  %v495_v41 = vrot.slane %v437_v8, 4  ;;  %v598_v57 = vmul.f32 %v1534_v15, %v1797_v46  ;;  %v1999_v8 = vld [vmem:[%s1532_s27 + $0xd8] sm:$0xff] }
  0x71   : > { %v856_v4 = vadd.f32 %v840_v22, %v820_v36  ;;  %v412_v9 = vadd.f32 %v371_v55, %v271_v47  ;;  %v722_v1 = vmul.f32 %v1536_v16, %v1797_v46  ;;  %v841_v50 = vmul.f32 %v1543_v20, %v1927_v2 }
  0x72   : > { %v496_v10 = vsel %vm471_vm1, %v493_v40, %v495_v41  ;;  %v655_v31 = vrot.slane %v598_v57, 2  ;;  %v882_v19 = vmul.f32 %v1545_v21, %v1959_v58  ;;  %v1006_v61 = vmul.f32 %v1578_v37, %v1959_v58  ;;  %v2007_v57 = vld [vmem:[%s1532_s27 + $0xe0] sm:$0xff] }
  0x73   : > { %v980_v49 = vadd.f32 %v938_v42, %v856_v4  ;;  %v537_v26 = vadd.f32 %v496_v10, %v412_v9  ;;  %v779_v22 = vrot.slane %v722_v1, 4  ;;  %v272_v53 = vmul.f32 %v1523_v11, %v1666_v60 }
  0x74   : > { %v656_v6 = vsel %vm346_vm0, %v653_v23, %v655_v31  ;;  %v939_v45 = vrot.slane %v882_v19, 2  ;;  %v1063_v30 = vrot.slane %v1006_v61, 4  ;;  %v313_v40 = vmul.f32 %v1525_v12, %v1666_v60 }
  0x75   : > { %v1104_v52 = vadd.f32 %v1062_v27, %v980_v49  ;;  %v573_v51 = vadd.f32 %v557_v48, %v537_v26  ;;  %v780_v5 = vsel %vm471_vm1, %v777_v34, %v779_v22  ;;  %v1983_v0 = vmul.f32 %v1525_v12, %v1682_v7 }
  0x76   : > { %v940_v56 = vsel %vm346_vm0, %v937_v32, %v939_v45  ;;  %v1064_v33 = vsel %vm471_vm1, %v1061_v24, %v1063_v30  ;;  %v372_v47 = vrot.slane %v313_v40, 2  ;;  %v438_v23 = vmul.f32 %v1527_v13, %v1666_v60 }
  0x77   : > { %1121 = vst.msk [vmem:[%s1658_s10 + $0x40] sm:$0xff] %vm1112_vm2, %v1104_v52  ;;  %v1144_v35 = vsel %vm1112_vm2, %v1104_v52, 0.0  ;;  %v1174_v39 = vmul.f32 %v1104_v52, %v1104_v52  ;;  %v697_v18 = vadd.f32 %v656_v6, %v573_v51  ;;  %v373_v34 = vrot.slane %v1983_v0, 2 }
  0x78   : > { %v1145_v38 = vadd.f32 %v1144_v35, %v1143_v25  ;;  %v439_v42 = vmul.f32 %v1527_v13, %v1682_v7  ;;  %v497_v32 = vrot.slane %v438_v23, 4  ;;  %v558_v24 = vmul.f32 %v1529_v14, %v1837_v54 }
  0x79   : > { %v1197_v17 = vsel %vm1112_vm2, %v1174_v39, 0.0  ;;  %v821_v60 = vadd.f32 %v780_v5, %v697_v18  ;;  %v374_v29 = vsel %vm346_vm0, %v372_v47, %v373_v34  ;;  %v599_v36 = vmul.f32 %v1534_v15, %v1837_v54 }
  0x7a   : > { %v1198_v27 = vadd.f32 %v1197_v17, %v1196_v28  ;;  %v413_v48 = vadd.f32 %v374_v29, %v272_v53  ;;  %v498_v25 = vrot.slane %v439_v42, 4  ;;  %v600_v55 = vmul.f32 %v1534_v15, %v1844_v63  ;;  %v2039_v29 = vld [vmem:[%s1532_s27 + $0xe8] sm:$0xf] }
  0x7b   : > { %v857_v41 = vadd.f32 %v841_v50, %v821_v60  ;;  %v657_v4 = vrot.slane %v599_v36, 2  ;;  %v723_v9 = vmul.f32 %v1536_v16, %v1837_v54  ;;  %v724_v1 = vmul.f32 %v1536_v16, %v1844_v63 }
  0x7c   : > { %v499_v10 = vsel %vm471_vm1, %v497_v32, %v498_v25  ;;  %v658_v31 = vrot.slane %v600_v55, 2  ;;  %v842_v28 = vmul.f32 %v1543_v20, %v1999_v8  ;;  %v883_v19 = vmul.f32 %v1545_v21, %v1999_v8 }
  0x7d   : > { %v981_v61 = vadd.f32 %v940_v56, %v857_v41  ;;  %v538_v50 = vadd.f32 %v499_v10, %v413_v48  ;;  %v781_v49 = vrot.slane %v723_v9, 4  ;;  %v782_v26 = vrot.slane %v724_v1, 4 }
  0x7e   : > { %v659_v22 = vsel %vm346_vm0, %v657_v4, %v658_v31  ;;  %v884_v53 = vmul.f32 %v1545_v21, %v2007_v57  ;;  %v941_v6 = vrot.slane %v883_v19, 2  ;;  %v1007_v45 = vmul.f32 %v1578_v37, %v1999_v8 }
  0x7f   : > { %v1105_v30 = vadd.f32 %v1064_v33, %v981_v61  ;;  %v574_v40 = vadd.f32 %v558_v24, %v538_v50  ;;  %v783_v52 = vsel %vm471_vm1, %v781_v49, %v782_v26  ;;  %v1008_v51 = vmul.f32 %v1578_v37, %v2007_v57 }
  0x80   : > { %v942_v5 = vrot.slane %v884_v53, 2  ;;  %v1065_v0 = vrot.slane %v1007_v45, 4  ;;  %v273_v56 = vmul.f32 %v1523_v11, %v1682_v7  ;;  %v315_v47 = vmul.f32 %v1525_v12, %v1716_v3 }
  0x81   : > { %1122 = vst.msk [vmem:[%s1658_s10 + $0x48] sm:$0xff] %vm1112_vm2, %v1105_v30  ;;  %v1146_v23 = vsel %vm1112_vm2, %v1105_v30, 0.0  ;;  %v1175_v33 = vmul.f32 %v1105_v30, %v1105_v30  ;;  %v698_v35 = vadd.f32 %v659_v22, %v574_v40  ;;  %v1066_v39 = vrot.slane %v1008_v51, 4 }
  0x82   : > { %v1147_v18 = vadd.f32 %v1146_v23, %v1145_v38  ;;  %v943_v42 = vsel %vm346_vm0, %v941_v6, %v942_v5  ;;  %v375_v32 = vrot.slane %v315_v47, 2  ;;  %v440_v24 = vmul.f32 %v1527_v13, %v1716_v3 }
  0x83   : > { %v1199_v17 = vsel %vm1112_vm2, %v1175_v33, 0.0  ;;  %v822_v7 = vadd.f32 %v783_v52, %v698_v35  ;;  %v1067_v60 = vsel %vm471_vm1, %v1065_v0, %v1066_v39  ;;  %v559_v36 = vmul.f32 %v1529_v14, %v1844_v63 }
  0x84   : > { %v1200_v48 = vadd.f32 %v1199_v17, %v1198_v27  ;;  %v376_v55 = vsel %vm346_vm0, %v373_v34, %v375_v32  ;;  %v500_v38 = vrot.slane %v440_v24, 4  ;;  %v601_v41 = vmul.f32 %v1534_v15, %v1878_v62  ;;  %v250_v32 = vld [vmem:[%s1532_s27 + $0xf0] sm:$0xff] }
  0x85   : > { %v858_v4 = vadd.f32 %v842_v28, %v822_v7  ;;  %v414_v9 = vadd.f32 %v376_v55, %v273_v56  ;;  %v725_v3 = vmul.f32 %v1536_v16, %v1878_v62  ;;  %v843_v1 = vmul.f32 %v1543_v20, %v2007_v57 }
  0x86   : > { %v501_v10 = vsel %vm471_vm1, %v498_v25, %v500_v38  ;;  %v660_v19 = vrot.slane %v601_v41, 2  ;;  %v885_v27 = vmul.f32 %v1545_v21, %v2039_v29  ;;  %v1009_v34 = vmul.f32 %v1578_v37, %v2039_v29  ;;  %v251_v38 = vld [vmem:[%s1532_s27 + $0xf8] sm:$0xff] }
  0x87   : > { %v982_v61 = vadd.f32 %v943_v42, %v858_v4  ;;  %v539_v50 = vadd.f32 %v501_v10, %v414_v9  ;;  %v784_v28 = vrot.slane %v725_v3, 4  ;;  %v274_v49 = vmul.f32 %v1523_v11, %v1752_v44 }
  0x88   : > { %v661_v22 = vsel %vm346_vm0, %v658_v31, %v660_v19  ;;  %v944_v53 = vrot.slane %v885_v27, 2  ;;  %v1068_v6 = vrot.slane %v1009_v34, 4  ;;  %v316_v25 = vmul.f32 %v1525_v12, %v1752_v44 }
  0x89   : > { %v1106_v45 = vadd.f32 %v1067_v60, %v982_v61  ;;  %v575_v30 = vadd.f32 %v559_v36, %v539_v50  ;;  %v785_v40 = vsel %vm471_vm1, %v782_v26, %v784_v28  ;;  %v2063_v37 = vmul.f32 %v1525_v12, %v1762_v59 }
  0x8a   : > { %v945_v52 = vsel %vm346_vm0, %v942_v5, %v944_v53  ;;  %v1069_v51 = vsel %vm471_vm1, %v1066_v39, %v1068_v6  ;;  %v377_v0 = vrot.slane %v316_v25, 2  ;;  %v441_v31 = vmul.f32 %v1527_v13, %v1752_v44 }
  0x8b   : > { %1123 = vst.msk [vmem:[%s1658_s10 + $0x50] sm:$0xff] %vm1112_vm2, %v1106_v45  ;;  %v1148_v56 = vsel %vm1112_vm2, %v1106_v45, 0.0  ;;  %v1176_v47 = vmul.f32 %v1106_v45, %v1106_v45  ;;  %v699_v23 = vadd.f32 %v661_v22, %v575_v30  ;;  %v378_v26 = vrot.slane %v2063_v37, 2 }
  0x8c   : > { %v1149_v33 = vadd.f32 %v1148_v56, %v1147_v18  ;;  %v442_v35 = vmul.f32 %v1527_v13, %v1762_v59  ;;  %v502_v5 = vrot.slane %v441_v31, 4  ;;  %v560_v39 = vmul.f32 %v1529_v14, %v1919_v43 }
  0x8d   : > { %v1201_v42 = vsel %vm1112_vm2, %v1176_v47, 0.0  ;;  %v823_v44 = vadd.f32 %v785_v40, %v699_v23  ;;  %v379_v24 = vsel %vm346_vm0, %v377_v0, %v378_v26  ;;  %v602_v17 = vmul.f32 %v1534_v15, %v1919_v43 }
  0x8e   : > { %v1202_v7 = vadd.f32 %v1201_v42, %v1200_v48  ;;  %v415_v60 = vadd.f32 %v379_v24, %v274_v49  ;;  %v503_v36 = vrot.slane %v442_v35, 4  ;;  %v603_v18 = vmul.f32 %v1534_v15, %v1927_v2  ;;  %v2097_v49 = vld [vmem:[%s2229_s1 + $0x8] ss:$0 sm:$0xff] }
  0x8f   : > { %v859_v55 = vadd.f32 %v843_v1, %v823_v44  ;;  %v662_v41 = vrot.slane %v602_v17, 2  ;;  %v726_v4 = vmul.f32 %v1536_v16, %v1919_v43  ;;  %v727_v9 = vmul.f32 %v1536_v16, %v1927_v2  ;;  %v252_v44 = vld [vmem:[%s1532_s27 + $0x100] sm:$0xf] }
  0x90   : > { %v504_v3 = vsel %vm471_vm1, %v502_v5, %v503_v36  ;;  %v663_v10 = vrot.slane %v603_v18, 2  ;;  %v844_v19 = vmul.f32 %v1543_v20, %v250_v32  ;;  %v886_v48 = vmul.f32 %v1545_v21, %v250_v32 }
  0x91   : > { %v983_v27 = vadd.f32 %v945_v52, %v859_v55  ;;  %v540_v34 = vadd.f32 %v504_v3, %v415_v60  ;;  %v786_v61 = vrot.slane %v726_v4, 4  ;;  %v787_v1 = vrot.slane %v727_v9, 4 }
  0x92   : > { %v664_v50 = vsel %vm346_vm0, %v662_v41, %v663_v10  ;;  %v887_v28 = vmul.f32 %v1545_v21, %v251_v38  ;;  %v946_v43 = vrot.slane %v886_v48, 2  ;;  %v1010_v22 = vmul.f32 %v2097_v49, %v250_v32 }
  0x93   : > { %v1107_v53 = vadd.f32 %v1069_v51, %v983_v27  ;;  %v576_v6 = vadd.f32 %v560_v39, %v540_v34  ;;  %v788_v25 = vsel %vm471_vm1, %v786_v61, %v787_v1  ;;  %v2102_v45 = vmul.f32 %v2097_v49, %v251_v38 }
  0x94   : > { %v947_v30 = vrot.slane %v887_v28, 2  ;;  %v1070_v40 = vrot.slane %v1010_v22, 4  ;;  %v275_v37 = vmul.f32 %v1523_v11, %v1762_v59  ;;  %v318_v52 = vmul.f32 %v1525_v12, %v1797_v46 }
  0x95   : > { %1124 = vst.msk [vmem:[%s1658_s10 + $0x58] sm:$0xff] %vm1112_vm2, %v1107_v53  ;;  %v1150_v0 = vsel %vm1112_vm2, %v1107_v53, 0.0  ;;  %v1177_v51 = vmul.f32 %v1107_v53, %v1107_v53  ;;  %v700_v31 = vadd.f32 %v664_v50, %v576_v6  ;;  %v1071_v56 = vrot.slane %v2102_v45, 4 }
  0x96   : > { %v1151_v47 = vadd.f32 %v1150_v0, %v1149_v33  ;;  %v380_v23 = vrot.slane %v318_v52, 2  ;;  %v443_v35 = vmul.f32 %v1527_v13, %v1797_v46  ;;  %v948_v59 = vsel %vm346_vm0, %v946_v43, %v947_v30  ;;  %v253_v0 = vld [vmem:[%s1532_s27 + $0x108] sm:$0xff] }
  0x97   : > { %v1203_v5 = vsel %vm1112_vm2, %v1177_v51, 0.0  ;;  %v824_v39 = vadd.f32 %v788_v25, %v700_v31  ;;  %v1072_v42 = vsel %vm471_vm1, %v1070_v40, %v1071_v56  ;;  %v604_v60 = vmul.f32 %v1534_v15, %v1959_v58 }
  0x98   : > { %v1204_v32 = vadd.f32 %v1203_v5, %v1202_v7  ;;  %v381_v24 = vsel %vm346_vm0, %v378_v26, %v380_v23  ;;  %v505_v17 = vrot.slane %v443_v35, 4  ;;  %v561_v46 = vmul.f32 %v1529_v14, %v1927_v2 }
  0x99   : > { %v860_v33 = vadd.f32 %v844_v19, %v824_v39  ;;  %v416_v18 = vadd.f32 %v381_v24, %v275_v37  ;;  %v728_v55 = vmul.f32 %v1536_v16, %v1959_v58  ;;  %v665_v4 = vrot.slane %v604_v60, 2 }
  0x9a   : > { %v506_v41 = vsel %vm471_vm1, %v503_v36, %v505_v17  ;;  %v888_v9 = vmul.f32 %v1545_v21, %v252_v44  ;;  %v1012_v7 = vmul.f32 %v2097_v49, %v252_v44  ;;  %v845_v19 = vmul.f32 %v1543_v20, %v251_v38 }
  0x9b   : > { %v984_v26 = vadd.f32 %v948_v59, %v860_v33  ;;  %v541_v3 = vadd.f32 %v506_v41, %v416_v18  ;;  %v789_v48 = vrot.slane %v728_v55, 4  ;;  %v666_v27 = vsel %vm346_vm0, %v663_v10, %v665_v4  ;;  %v254_v59 = vld [vmem:[%s1532_s27 + $0x110] sm:$0xff] }
  0x9c   : > { %v949_v34 = vrot.slane %v888_v9, 2  ;;  %v276_v2 = vmul.f32 %v1523_v11, %v1837_v54  ;;  %v319_v58 = vmul.f32 %v1525_v12, %v1837_v54  ;;  %v1073_v50 = vrot.slane %v1012_v7, 4 }
  0x9d   : > { %v1108_v36 = vadd.f32 %v1072_v42, %v984_v26  ;;  %v577_v61 = vadd.f32 %v561_v46, %v541_v3  ;;  %v2136_v28 = vmul.f32 %v1525_v12, %v1844_v63  ;;  %v790_v43 = vsel %vm471_vm1, %v787_v1, %v789_v48 }
  0x9e   : > { %v950_v38 = vsel %vm346_vm0, %v947_v30, %v949_v34  ;;  %v382_v10 = vrot.slane %v319_v58, 2  ;;  %v444_v22 = vmul.f32 %v1527_v13, %v1837_v54  ;;  %v445_v37 = vmul.f32 %v1527_v13, %v1844_v63 }
  0x9f   : > { %1125 = vst.msk [vmem:[%s1658_s10 + $0x60] sm:$0xff] %vm1112_vm2, %v1108_v36  ;;  %v1152_v53 = vsel %vm1112_vm2, %v1108_v36, 0.0  ;;  %v1178_v6 = vmul.f32 %v1108_v36, %v1108_v36  ;;  %v701_v25 = vadd.f32 %v666_v27, %v577_v61  ;;  %v383_v45 = vrot.slane %v2136_v28, 2 }
  0xa0   : > { %v1153_v40 = vadd.f32 %v1152_v53, %v1151_v47  ;;  %v507_v1 = vrot.slane %v444_v22, 4  ;;  %v562_v30 = vmul.f32 %v1529_v14, %v1999_v8  ;;  %v605_v31 = vmul.f32 %v1534_v15, %v1999_v8 }
  0xa1   : > { %v1205_v52 = vsel %vm1112_vm2, %v1178_v6, 0.0  ;;  %v825_v54 = vadd.f32 %v790_v43, %v701_v25  ;;  %v384_v51 = vsel %vm346_vm0, %v382_v10, %v383_v45  ;;  %v508_v5 = vrot.slane %v445_v37, 4  ;;  %v255_v6 = vld [vmem:[%s1532_s27 + $0x118] sm:$0xf] }
  0xa2   : > { %v1206_v23 = vadd.f32 %v1205_v52, %v1204_v32  ;;  %v417_v35 = vadd.f32 %v384_v51, %v276_v2  ;;  %v606_v47 = vmul.f32 %v1534_v15, %v2007_v57  ;;  %v667_v42 = vrot.slane %v605_v31, 2 }
  0xa3   : > { %v861_v39 = vadd.f32 %v845_v19, %v825_v54  ;;  %v729_v44 = vmul.f32 %v1536_v16, %v1999_v8  ;;  %v730_v24 = vmul.f32 %v1536_v16, %v2007_v57  ;;  %v1074_v17 = vsel %vm471_vm1, %v1071_v56, %v1073_v50 }
  0xa4   : > { %v509_v60 = vsel %vm471_vm1, %v507_v1, %v508_v5  ;;  %v668_v33 = vrot.slane %v606_v47, 2  ;;  %v889_v32 = vmul.f32 %v1545_v21, %v253_v0  ;;  %v846_v9 = vmul.f32 %v1543_v20, %v253_v0 }
  0xa5   : > { %v985_v18 = vadd.f32 %v950_v38, %v861_v39  ;;  %v542_v46 = vadd.f32 %v509_v60, %v417_v35  ;;  %v791_v55 = vrot.slane %v729_v44, 4  ;;  %v792_v41 = vrot.slane %v730_v24, 4 }
  0xa6   : > { %v669_v4 = vsel %vm346_vm0, %v667_v42, %v668_v33  ;;  %v890_v8 = vmul.f32 %v1545_v21, %v254_v59  ;;  %v1013_v7 = vmul.f32 %v2097_v49, %v253_v0  ;;  %v951_v3 = vrot.slane %v889_v32, 2 }
  0xa7   : > { %v1109_v26 = vadd.f32 %v1074_v17, %v985_v18  ;;  %v578_v56 = vadd.f32 %v562_v30, %v542_v46  ;;  %v1014_v48 = vmul.f32 %v2097_v49, %v254_v59  ;;  %v793_v19 = vsel %vm471_vm1, %v791_v55, %v792_v41 }
  0xa8   : > { %v952_v27 = vrot.slane %v890_v8, 2  ;;  %v1075_v34 = vrot.slane %v1013_v7, 4  ;;  %v321_v2 = vmul.f32 %v1525_v12, %v1878_v62  ;;  %v277_v50 = vmul.f32 %v1523_v11, %v1844_v63 }
  0xa9   : > { %1126 = vst.msk [vmem:[%s1658_s10 + $0x68] sm:$0xff] %vm1112_vm2, %v1109_v26  ;;  %v1154_v58 = vsel %vm1112_vm2, %v1109_v26, 0.0  ;;  %v1179_v36 = vmul.f32 %v1109_v26, %v1109_v26  ;;  %v702_v61 = vadd.f32 %v669_v4, %v578_v56  ;;  %v1076_v43 = vrot.slane %v1014_v48, 4 }
  0xaa   : > { %v1155_v28 = vadd.f32 %v1154_v58, %v1153_v40  ;;  %v385_v38 = vrot.slane %v321_v2, 2  ;;  %v446_v10 = vmul.f32 %v1527_v13, %v1878_v62  ;;  %v953_v12 = vsel %vm346_vm0, %v951_v3, %v952_v27 }
  0xab   : > { %v1207_v22 = vsel %vm1112_vm2, %v1179_v36, 0.0  ;;  %v826_v53 = vadd.f32 %v793_v19, %v702_v61  ;;  %v607_v30 = vmul.f32 %v1534_v15, %v2039_v29  ;;  %v563_v40 = vmul.f32 %v1529_v14, %v2007_v57 }
  0xac   : > { %v1208_v25 = vadd.f32 %v1207_v22, %v1206_v23  ;;  %v386_v37 = vsel %vm346_vm0, %v383_v45, %v385_v38  ;;  %v510_v1 = vrot.slane %v446_v10, 4  ;;  %v731_v13 = vmul.f32 %v1536_v16, %v2039_v29 }
  0xad   : > { %v862_v11 = vadd.f32 %v846_v9, %v826_v53  ;;  %v418_v63 = vadd.f32 %v386_v37, %v277_v50  ;;  %v1077_v62 = vsel %vm471_vm1, %v1075_v34, %v1076_v43  ;;  %v670_v54 = vrot.slane %v607_v30, 2 }
  0xae   : > { %v511_v52 = vsel %vm471_vm1, %v508_v5, %v510_v1  ;;  %v891_v45 = vmul.f32 %v1545_v21, %v255_v6  ;;  %v794_v31 = vrot.slane %v731_v13, 4  ;;  %v1015_v23 = vmul.f32 %v2097_v49, %v255_v6 }
  0xaf   : > { %v986_v0 = vadd.f32 %v953_v12, %v862_v11  ;;  %v543_v51 = vadd.f32 %v511_v52, %v418_v63  ;;  %v671_v15 = vsel %vm346_vm0, %v668_v33, %v670_v54  ;;  %v847_v21 = vmul.f32 %v1543_v20, %v254_v59 }
  0xb0   : > { %v795_v14 = vsel %vm471_vm1, %v792_v41, %v794_v31  ;;  %v954_v57 = vrot.slane %v891_v45, 2  ;;  %v1078_v42 = vrot.slane %v1015_v23, 4 }
  0xb1   : > { %v1110_v35 = vadd.f32 %v1077_v62, %v986_v0  ;;  %v579_v47 = vadd.f32 %v563_v40, %v543_v51 }
  0xb2   : > { %v955_v17 = vsel %vm346_vm0, %v952_v27, %v954_v57  ;;  %v1079_v33 = vsel %vm471_vm1, %v1076_v43, %v1078_v42 }
  0xb3   : > { %1127 = vst.msk [vmem:[%s1658_s10 + $0x70] sm:$0xff] %vm1112_vm2, %v1110_v35  ;;  %v1156_v16 = vsel %vm1112_vm2, %v1110_v35, 0.0  ;;  %v1180_v29 = vmul.f32 %v1110_v35, %v1110_v35  ;;  %v703_v5 = vadd.f32 %v671_v15, %v579_v47 }
  0xb4   : > { %v1157_v39 = vadd.f32 %v1156_v16, %v1155_v28 }
  0xb5   : > { %v1209_v44 = vsel %vm1112_vm2, %v1180_v29, 0.0  ;;  %v827_v49 = vadd.f32 %v795_v14, %v703_v5 }
  0xb6   : > { %v1210_v24 = vadd.f32 %v1209_v44, %v1208_v25 }
  0xb7   : > { %v863_v60 = vadd.f32 %v847_v21, %v827_v49 }
  0xb9   : > { %v987_v32 = vadd.f32 %v955_v17, %v863_v60 }
  0xbb   : > { %v1111_v18 = vadd.f32 %v1079_v33, %v987_v32 }
  0xbd   : > { %1128 = vst.msk [vmem:[%s1658_s10 + $0x78] sm:$0xff] %vm1112_vm2, %v1111_v18  ;;  %v1158_v46 = vsel %vm1112_vm2, %v1111_v18, 0.0  ;;  %v1181_v20 = vmul.f32 %v1111_v18, %v1111_v18 }
  0xbe   : > { %v1159_v59 = vadd.f32 %v1158_v46, %v1157_v39 }
  0xbf   : > { %v1211_v55 = vsel %vm1112_vm2, %v1181_v20, 0.0 }
  0xc0   : > { %v1160_v41 = vrot.slane %v1159_v59, 4  ;;  %v1212_v4 = vadd.f32 %v1211_v55, %v1210_v24 }
  0xc2   : > { %v1161_v9 = vadd.f32 %v1160_v41, %v1159_v59  ;;  %v1213_v8 = vrot.slane %v1212_v4, 4 }
  0xc4   : > { %v1162_v7 = vrot.slane %v1161_v9, 2  ;;  %v1214_v26 = vadd.f32 %v1213_v8, %v1212_v4 }
  0xc6   : > { %v1163_v56 = vadd.f32 %v1162_v7, %v1161_v9  ;;  %v1215_v3 = vrot.slane %v1214_v26, 2 }
  0xc8   : > { %v1164_v48 = vrot.slane %v1163_v56, 1  ;;  %v1216_v19 = vadd.f32 %v1215_v3, %v1214_v26 }
  0xca   : > { %v1165_v27 = vadd.f32 %v1164_v48, %v1163_v56  ;;  %v1217_v34 = vrot.slane %v1216_v19, 1 }
  0xcc   : > { %v1218_v2 = vadd.f32 %v1217_v34, %v1216_v19 }
  0xce   : > { %v1220_v58 = vsel %vm1219_vm3, %v1165_v27, %v1218_v2 }
  0xcf   : > { %1222 = vst.msk [vmem:[%s216_s25] sm:$0x3] %vm1221_vm4, %v1220_v58 }
  0xd0 PF: > { %s14_s16 = sadd.s32 1, %s1459_s16   ;;  %s2233_s12 = smov %s1451_s14 }
  0xd1   : > { %p11_p8 = scmp.ge.s32.totalorder %s14_s16, 6   ;;  %s2234_s13 = smov %s1455_s15 }
  0xd2   : > { %s2235_s14 = smov %s2238_s17  ;;  %s2236_s15 = smov %s2242_s18 }
  0xd3   :  { %13 = sbr.rel (!%p11_p8) target bundleno = 3 (0x3), region = 71 }

</bundles_post_ra>
